<compile_context>
chip_gen: v7x
topology: tpu7x:2x2x1
jax: 0.10.0
libtpu: 0.0.40
codegen_flags: <defaults>
</compile_context>

<pallas_src>
import functools

import numpy as np
import jax
import jax.numpy as jnp
from jax import lax
from jax.experimental import pallas as pl
from jax.experimental.pallas import tpu as pltpu


_PAD_MODE_JNP = {"zeros": "constant", "reflect": "reflect",
                 "replicate": "edge", "circular": "wrap"}


def _softplus(x):
    # Numerically stable softplus: max(x, 0) + log(1 + exp(-|x|)).
    return jnp.maximum(x, 0.0) + jnp.log(1.0 + jnp.exp(-jnp.abs(x)))


def _pad_gather(L, P, mode):
    """(L, L + 2P) one-hot gather matrix M so x_padded = x @ M reproduces
    Conv1d's padding_mode along length (columns gathering nothing stay 0)."""
    M = np.zeros((L, L + 2 * P), np.float32)
    for j in range(L + 2 * P):
        i = j - P
        if mode == "zeros":
            if 0 <= i < L:
                M[i, j] = 1.0
            continue
        if mode == "replicate":
            s = min(max(i, 0), L - 1)
        elif mode == "circular":
            s = i % L
        elif mode == "reflect":
            s = abs(i)
            if s >= L:
                s = 2 * (L - 1) - s
        else:
            raise ValueError(f"unsupported padding_mode: {mode}")
        M[s, j] = 1.0
    return M


def dft_fused_kernel(x_ref, *args, K, LW, n_layers, C_last):
    """One batch sample per grid step; activations never leave vregs/VMEM.

    Per layer l (all matrices precomputed on the host, lane width LW % 128 == 0):
      shifted = act @ padA_l                      # pad + K im2col shifts fused
      conv    = sum_t W_t @ shifted[:, t*LW:(t+1)*LW] + b
      act     = softplus(conv) @ poolA_l          # AvgPool1d as one matmul
    Flatten + Linear are folded into C_last tiny matmuls against per-channel
    slices of the FC weight (no flatten scratch, no masked stores).
    """
    layer_refs = [args[4 * l: 4 * l + 4] for l in range(n_layers)]
    wfc_ref = args[4 * n_layers]       # (C_last, LW, O)
    bfc_ref = args[4 * n_layers + 1]   # (1, O)
    out_ref = args[4 * n_layers + 2]   # (1, 1, O)

    act = x_ref[0]                                              # (C0, L0)
    for (padA_ref, w_ref, b_ref, poolA_ref) in layer_refs:
        # pad + all K taps in one lane-dense MXU matmul: (C_in, K*LW)
        shifted = jnp.dot(act, padA_ref[...],
                          preferred_element_type=jnp.float32)
        acc = None
        for t in range(K):                                      # aligned slices
            part = jnp.dot(w_ref[t], shifted[:, t * LW:(t + 1) * LW],
                           preferred_element_type=jnp.float32)  # (C_out, LW)
            acc = part if acc is None else acc + part
        y = _softplus(acc + b_ref[...])                         # (C_out, LW)
        # AvgPool1d: pool matrix also zeroes every column past the valid length.
        act = jnp.dot(y, poolA_ref[...],
                      preferred_element_type=jnp.float32)       # (C_out, LW)

    # Flatten + Linear folded together: out += act[c, :] @ W_fc_channel_c.
    out = bfc_ref[...]                                          # (1, O)
    for c in range(C_last):
        out = out + jnp.dot(act[c:c + 1, :], wfc_ref[c],
                            preferred_element_type=jnp.float32)
    out_ref[...] = out.reshape(out_ref.shape).astype(out_ref.dtype)


def _const_index_map(ndim):
    return lambda n: (0,) * ndim


def prepare_dft(params, *, input_size, kernel_size, padding, padding_mode,
                pooling_size):
    """One-time conversion of PyTorch-shaped params into kernel-ready,
    lane-dense layouts plus static dims and cost numbers."""
    K, P, pool = kernel_size, padding, pooling_size

    dims = []
    L = input_size
    for (w, _) in params["conv"]:
        C_out, C_in, _k = w.shape
        L_pad = L + 2 * P
        L_conv = L_pad - K + 1
        L_pool = L_conv // pool
        dims.append((C_in, C_out, L, L_pad, L_conv, L_pool))
        L = L_pool
    max_len = max(max(d[4] for d in dims), input_size)
    LW = ((max_len + 127) // 128) * 128          # lane-dense working width

    inputs = []
    flops = 0
    trans = 0
    for l, ((w, b), (C_in, C_out, L_in, L_pad, L_conv, L_pool)) in enumerate(
            zip(params["conv"], dims)):
        LWin = L_in if l == 0 else LW            # raw input length for layer 0
        padM = _pad_gather(L_in, P, padding_mode)            # (L_in, L_pad)
        # Fuse padding + tap-t shift into one gather matrix per tap, packed
        # side by side so a single matmul produces all K shifted copies.
        padA = np.zeros((LWin, K * LW), np.float32)
        for t in range(K):
            padA[:L_in, t * LW: t * LW + L_conv] = padM[:, t:t + L_conv]
        # AvgPool1d(kernel=stride=pool); rows >= L_conv and cols >= L_pool are 0.
        poolA = np.zeros((LW, LW), np.float32)
        for p_ in range(L_pool):
            poolA[p_ * pool:(p_ + 1) * pool, p_] = 1.0 / pool
        w_taps = jnp.asarray(jnp.transpose(w, (2, 0, 1)))    # (K, C_out, C_in)
        inputs += [jnp.asarray(padA), w_taps,
                   jnp.asarray(b).reshape(C_out, 1), jnp.asarray(poolA)]
        flops += (2 * C_in * LWin * K * LW + K * 2 * C_out * C_in * LW
                  + 2 * C_out * LW * LW + 6 * C_out * LW)
        trans += 2 * C_out * LW

    w_fc, b_fc = params["fc"]
    O = int(w_fc.shape[0])
    C_last, L_last = dims[-1][1], dims[-1][5]
    # Per-channel FC weight slabs: wfc3[c, j, o] = w_fc[o, c*L_last + j].
    wfc_np = np.asarray(w_fc)
    wfc3 = np.zeros((C_last, LW, O), np.float32)
    for c in range(C_last):
        wfc3[c, :L_last, :] = wfc_np[:, c * L_last:(c + 1) * L_last].T
    inputs += [jnp.asarray(wfc3), jnp.asarray(b_fc).reshape(1, O)]
    flops += C_last * 2 * LW * O + O

    return dict(inputs=inputs, K=K, LW=LW, n_layers=len(dims), C_last=C_last,
                out_dim=O, per_sample_flops=int(flops),
                per_sample_transcendentals=int(trans))


def dft_forward(x, prep):
    N = x.shape[0]
    O = prep["out_dim"]
    kernel = functools.partial(dft_fused_kernel, K=prep["K"], LW=prep["LW"],
                               n_layers=prep["n_layers"],
                               C_last=prep["C_last"])

    in_specs = [pl.BlockSpec((1,) + x.shape[1:], lambda n: (n, 0, 0))]
    for arr in prep["inputs"]:
        in_specs.append(pl.BlockSpec(arr.shape, _const_index_map(arr.ndim)))

    param_bytes = sum(int(a.size) * a.dtype.itemsize for a in prep["inputs"])
    cost = pl.CostEstimate(
        flops=int(N * prep["per_sample_flops"]),
        transcendentals=int(N * prep["per_sample_transcendentals"]),
        bytes_accessed=int(param_bytes + x.size * x.dtype.itemsize + N * O * 4))

    out3 = pl.pallas_call(
        kernel,
        grid=(N,),
        out_shape=jax.ShapeDtypeStruct((N, 1, O), x.dtype),
        in_specs=in_specs,
        out_specs=pl.BlockSpec((1, 1, O), lambda n: (n, 0, 0)),
        compiler_params=pltpu.CompilerParams(
            dimension_semantics=("parallel",),
            vmem_limit_bytes=32 * 1024 * 1024),
        cost_estimate=cost,
    )(x, *prep["inputs"])
    return out3.reshape(N, O)


def dft_forward_ref(x, params, *, kernel_size, padding, padding_mode,
                    pooling_size):
    """Pure-JAX reference (XLA conv) for correctness checking."""
    pad_mode = _PAD_MODE_JNP[padding_mode]
    for (w, b) in params["conv"]:
        x_pad = jnp.pad(x, ((0, 0), (0, 0), (padding, padding)), mode=pad_mode)
        y = lax.conv_general_dilated(
            x_pad, w, window_strides=(1,), padding="VALID",
            dimension_numbers=("NCH", "OIH", "NCH"))
        y = _softplus(y + b[None, :, None])
        N, C, L = y.shape
        Lp = L // pooling_size
        x = y[:, :, :Lp * pooling_size].reshape(N, C, Lp, pooling_size).mean(-1)
    x = x.reshape(x.shape[0], -1)
    w_fc, b_fc = params["fc"]
    return x @ w_fc.T + b_fc[None, :]


def init_params(key, input_channel, hidden_channel, input_size, output_size,
                kernel_size, pooling_size):
    """Deterministic synthetic parameters (PyTorch-shaped)."""
    params = {"conv": []}
    c_in = input_channel
    for c_out in hidden_channel:
        key, k1, k2 = jax.random.split(key, 3)
        bound = 1.0 / (c_in * kernel_size) ** 0.5
        w = jax.random.uniform(k1, (c_out, c_in, kernel_size), jnp.float32,
                               -bound, bound)
        b = jax.random.uniform(k2, (c_out,), jnp.float32, -bound, bound)
        params["conv"].append((w, b))
        c_in = c_out
    feat = hidden_channel[-1] * int(input_size / pooling_size ** len(hidden_channel))
    key, k1, k2 = jax.random.split(key, 3)
    bound = 1.0 / feat ** 0.5
    w_fc = jax.random.uniform(k1, (output_size, feat), jnp.float32, -bound, bound)
    b_fc = jax.random.uniform(k2, (output_size,), jnp.float32, -bound, bound)
    params["fc"] = (w_fc, b_fc)
    return params


if __name__ == "__main__":
    # Module hyperparameters (small, consistent with the forward pass):
    input_size = 16
    input_channel = 4
    hidden_channel = [8, 16]
    output_size = 10
    kernel_size = 3
    padding = 1
    padding_mode = "zeros"
    pooling_size = 2
    batch = 2

    key = jax.random.PRNGKey(0)
    kx, kp = jax.random.split(key)
    x = jax.random.normal(kx, (batch, input_channel, input_size), jnp.float32)
    params = init_params(kp, input_channel, hidden_channel, input_size,
                         output_size, kernel_size, pooling_size)

    prep = prepare_dft(params, input_size=input_size, kernel_size=kernel_size,
                       padding=padding, padding_mode=padding_mode,
                       pooling_size=pooling_size)

    out = dft_forward(x, prep)
    out = jax.block_until_ready(out)

    ref = dft_forward_ref(x, params, kernel_size=kernel_size, padding=padding,
                          padding_mode=padding_mode, pooling_size=pooling_size)
    assert out.shape == (batch, output_size), out.shape
    assert jnp.allclose(out, ref, atol=1e-4, rtol=1e-4), (out, ref)
    print("KERNEL_OK")
</pallas_src>

<mosaic_0001>
module attributes {stable_mosaic.version = 11 : i64} {
  func.func @dft_fused_kernel(%arg0: i32, %arg1: memref<1x4x16xf32, #tpu.memory_space<vmem>>, %arg2: memref<16x384xf32, #tpu.memory_space<vmem>>, %arg3: memref<3x8x4xf32, #tpu.memory_space<vmem>>, %arg4: memref<8x1xf32, #tpu.memory_space<vmem>>, %arg5: memref<128x128xf32, #tpu.memory_space<vmem>>, %arg6: memref<128x384xf32, #tpu.memory_space<vmem>>, %arg7: memref<3x16x8xf32, #tpu.memory_space<vmem>>, %arg8: memref<16x1xf32, #tpu.memory_space<vmem>>, %arg9: memref<128x128xf32, #tpu.memory_space<vmem>>, %arg10: memref<16x128x10xf32, #tpu.memory_space<vmem>>, %arg11: memref<1x10xf32, #tpu.memory_space<vmem>>, %arg12: memref<1x1x10xf32, #tpu.memory_space<vmem>>) attributes {dimension_semantics = [#tpu.dimension_semantics<parallel>], iteration_bounds = array<i64: 2>, scalar_prefetch = 0 : i64, scratch_operands = 0 : i64, tpu.core_type = #tpu.core_type<tc>, window_params = [{transform_indices = @transform_0, window_bounds = array<i64: 1, 4, 16>}, {pipeline_mode = #tpu.pipeline_mode<synchronous>, transform_indices = @transform_1, window_bounds = array<i64: 16, 384>}, {pipeline_mode = #tpu.pipeline_mode<synchronous>, transform_indices = @transform_2, window_bounds = array<i64: 3, 8, 4>}, {pipeline_mode = #tpu.pipeline_mode<synchronous>, transform_indices = @transform_3, window_bounds = array<i64: 8, 1>}, {pipeline_mode = #tpu.pipeline_mode<synchronous>, transform_indices = @transform_4, window_bounds = array<i64: 128, 128>}, {pipeline_mode = #tpu.pipeline_mode<synchronous>, transform_indices = @transform_5, window_bounds = array<i64: 128, 384>}, {pipeline_mode = #tpu.pipeline_mode<synchronous>, transform_indices = @transform_6, window_bounds = array<i64: 3, 16, 8>}, {pipeline_mode = #tpu.pipeline_mode<synchronous>, transform_indices = @transform_7, window_bounds = array<i64: 16, 1>}, {pipeline_mode = #tpu.pipeline_mode<synchronous>, transform_indices = @transform_8, window_bounds = array<i64: 128, 128>}, {pipeline_mode = #tpu.pipeline_mode<synchronous>, transform_indices = @transform_9, window_bounds = array<i64: 16, 128, 10>}, {pipeline_mode = #tpu.pipeline_mode<synchronous>, transform_indices = @transform_10, window_bounds = array<i64: 1, 10>}, {transform_indices = @transform_11, window_bounds = array<i64: 1, 1, 10>}]} {
    %c0 = arith.constant 0 : index
    %c0_0 = arith.constant 0 : index
    %c0_1 = arith.constant 0 : index
    %0 = vector.load %arg1[%c0, %c0_0, %c0_1] : memref<1x4x16xf32, #tpu.memory_space<vmem>>, vector<1x4x16xf32>
    %1 = vector.shape_cast %0 : vector<1x4x16xf32> to vector<4x16xf32>
    %c0_2 = arith.constant 0 : index
    %c0_3 = arith.constant 0 : index
    %2 = vector.load %arg2[%c0_2, %c0_3] : memref<16x384xf32, #tpu.memory_space<vmem>>, vector<16x384xf32>
    %cst = arith.constant dense<0.000000e+00> : vector<4x384xf32>
    %3 = tpu.matmul %1, %2, %cst {dimension_numbers = #tpu.dot_dimension_numbers<[1], [0], [0], [1], [0, 0, 1, 1], [], []>} : vector<4x16xf32>, vector<16x384xf32>, vector<4x384xf32> -> vector<4x384xf32>
    %c0_4 = arith.constant 0 : index
    %c0_5 = arith.constant 0 : index
    %c0_6 = arith.constant 0 : index
    %4 = vector.load %arg3[%c0_4, %c0_5, %c0_6] : memref<3x8x4xf32, #tpu.memory_space<vmem>>, vector<1x8x4xf32>
    %5 = vector.shape_cast %4 : vector<1x8x4xf32> to vector<8x4xf32>
    %6 = vector.extract_strided_slice %3 {offsets = [0, 0], sizes = [4, 128], strides = [1, 1]} : vector<4x384xf32> to vector<4x128xf32>
    %cst_7 = arith.constant dense<0.000000e+00> : vector<8x128xf32>
    %7 = tpu.matmul %5, %6, %cst_7 {dimension_numbers = #tpu.dot_dimension_numbers<[1], [0], [0], [1], [0, 0, 1, 1], [], []>} : vector<8x4xf32>, vector<4x128xf32>, vector<8x128xf32> -> vector<8x128xf32>
    %c1 = arith.constant 1 : index
    %c0_8 = arith.constant 0 : index
    %c0_9 = arith.constant 0 : index
    %8 = vector.load %arg3[%c1, %c0_8, %c0_9] : memref<3x8x4xf32, #tpu.memory_space<vmem>>, vector<1x8x4xf32>
    %9 = vector.shape_cast %8 : vector<1x8x4xf32> to vector<8x4xf32>
    %10 = vector.extract_strided_slice %3 {offsets = [0, 128], sizes = [4, 128], strides = [1, 1]} : vector<4x384xf32> to vector<4x128xf32>
    %cst_10 = arith.constant dense<0.000000e+00> : vector<8x128xf32>
    %11 = tpu.matmul %9, %10, %cst_10 {dimension_numbers = #tpu.dot_dimension_numbers<[1], [0], [0], [1], [0, 0, 1, 1], [], []>} : vector<8x4xf32>, vector<4x128xf32>, vector<8x128xf32> -> vector<8x128xf32>
    %12 = arith.addf %7, %11 : vector<8x128xf32>
    %c2 = arith.constant 2 : index
    %c0_11 = arith.constant 0 : index
    %c0_12 = arith.constant 0 : index
    %13 = vector.load %arg3[%c2, %c0_11, %c0_12] : memref<3x8x4xf32, #tpu.memory_space<vmem>>, vector<1x8x4xf32>
    %14 = vector.shape_cast %13 : vector<1x8x4xf32> to vector<8x4xf32>
    %15 = vector.extract_strided_slice %3 {offsets = [0, 256], sizes = [4, 128], strides = [1, 1]} : vector<4x384xf32> to vector<4x128xf32>
    %cst_13 = arith.constant dense<0.000000e+00> : vector<8x128xf32>
    %16 = tpu.matmul %14, %15, %cst_13 {dimension_numbers = #tpu.dot_dimension_numbers<[1], [0], [0], [1], [0, 0, 1, 1], [], []>} : vector<8x4xf32>, vector<4x128xf32>, vector<8x128xf32> -> vector<8x128xf32>
    %17 = arith.addf %12, %16 : vector<8x128xf32>
    %c0_14 = arith.constant 0 : index
    %c0_15 = arith.constant 0 : index
    %18 = vector.load %arg4[%c0_14, %c0_15] : memref<8x1xf32, #tpu.memory_space<vmem>>, vector<8x1xf32>
    %19 = vector.broadcast %18 : vector<8x1xf32> to vector<8x128xf32>
    %20 = arith.addf %17, %19 : vector<8x128xf32>
    %cst_16 = arith.constant 0.000000e+00 : f32
    %21 = vector.broadcast %cst_16 : f32 to vector<8x128xf32>
    %22 = arith.maximumf %20, %21 : vector<8x128xf32>
    %23 = math.absf %20 : vector<8x128xf32>
    %cst_17 = arith.constant 0.000000e+00 : f32
    %24 = vector.broadcast %cst_17 : f32 to vector<8x128xf32>
    %25 = arith.subf %24, %23 : vector<8x128xf32>
    %26 = math.exp %25 : vector<8x128xf32>
    %cst_18 = arith.constant 1.000000e+00 : f32
    %27 = vector.broadcast %cst_18 : f32 to vector<8x128xf32>
    %28 = arith.addf %27, %26 : vector<8x128xf32>
    %29 = math.log %28 : vector<8x128xf32>
    %30 = arith.addf %22, %29 : vector<8x128xf32>
    %c0_19 = arith.constant 0 : index
    %c0_20 = arith.constant 0 : index
    %31 = vector.load %arg5[%c0_19, %c0_20] : memref<128x128xf32, #tpu.memory_space<vmem>>, vector<128x128xf32>
    %cst_21 = arith.constant dense<0.000000e+00> : vector<8x128xf32>
    %32 = tpu.matmul %30, %31, %cst_21 {dimension_numbers = #tpu.dot_dimension_numbers<[1], [0], [0], [1], [0, 0, 1, 1], [], []>} : vector<8x128xf32>, vector<128x128xf32>, vector<8x128xf32> -> vector<8x128xf32>
    %c0_22 = arith.constant 0 : index
    %c0_23 = arith.constant 0 : index
    %33 = vector.load %arg6[%c0_22, %c0_23] : memref<128x384xf32, #tpu.memory_space<vmem>>, vector<128x384xf32>
    %cst_24 = arith.constant dense<0.000000e+00> : vector<8x384xf32>
    %34 = tpu.matmul %32, %33, %cst_24 {dimension_numbers = #tpu.dot_dimension_numbers<[1], [0], [0], [1], [0, 0, 1, 1], [], []>} : vector<8x128xf32>, vector<128x384xf32>, vector<8x384xf32> -> vector<8x384xf32>
    %c0_25 = arith.constant 0 : index
    %c0_26 = arith.constant 0 : index
    %c0_27 = arith.constant 0 : index
    %35 = vector.load %arg7[%c0_25, %c0_26, %c0_27] : memref<3x16x8xf32, #tpu.memory_space<vmem>>, vector<1x16x8xf32>
    %36 = vector.shape_cast %35 : vector<1x16x8xf32> to vector<16x8xf32>
    %37 = vector.extract_strided_slice %34 {offsets = [0, 0], sizes = [8, 128], strides = [1, 1]} : vector<8x384xf32> to vector<8x128xf32>
    %cst_28 = arith.constant dense<0.000000e+00> : vector<16x128xf32>
    %38 = tpu.matmul %36, %37, %cst_28 {dimension_numbers = #tpu.dot_dimension_numbers<[1], [0], [0], [1], [0, 0, 1, 1], [], []>} : vector<16x8xf32>, vector<8x128xf32>, vector<16x128xf32> -> vector<16x128xf32>
    %c1_29 = arith.constant 1 : index
    %c0_30 = arith.constant 0 : index
    %c0_31 = arith.constant 0 : index
    %39 = vector.load %arg7[%c1_29, %c0_30, %c0_31] : memref<3x16x8xf32, #tpu.memory_space<vmem>>, vector<1x16x8xf32>
    %40 = vector.shape_cast %39 : vector<1x16x8xf32> to vector<16x8xf32>
    %41 = vector.extract_strided_slice %34 {offsets = [0, 128], sizes = [8, 128], strides = [1, 1]} : vector<8x384xf32> to vector<8x128xf32>
    %cst_32 = arith.constant dense<0.000000e+00> : vector<16x128xf32>
    %42 = tpu.matmul %40, %41, %cst_32 {dimension_numbers = #tpu.dot_dimension_numbers<[1], [0], [0], [1], [0, 0, 1, 1], [], []>} : vector<16x8xf32>, vector<8x128xf32>, vector<16x128xf32> -> vector<16x128xf32>
    %43 = arith.addf %38, %42 : vector<16x128xf32>
    %c2_33 = arith.constant 2 : index
    %c0_34 = arith.constant 0 : index
    %c0_35 = arith.constant 0 : index
    %44 = vector.load %arg7[%c2_33, %c0_34, %c0_35] : memref<3x16x8xf32, #tpu.memory_space<vmem>>, vector<1x16x8xf32>
    %45 = vector.shape_cast %44 : vector<1x16x8xf32> to vector<16x8xf32>
    %46 = vector.extract_strided_slice %34 {offsets = [0, 256], sizes = [8, 128], strides = [1, 1]} : vector<8x384xf32> to vector<8x128xf32>
    %cst_36 = arith.constant dense<0.000000e+00> : vector<16x128xf32>
    %47 = tpu.matmul %45, %46, %cst_36 {dimension_numbers = #tpu.dot_dimension_numbers<[1], [0], [0], [1], [0, 0, 1, 1], [], []>} : vector<16x8xf32>, vector<8x128xf32>, vector<16x128xf32> -> vector<16x128xf32>
    %48 = arith.addf %43, %47 : vector<16x128xf32>
    %c0_37 = arith.constant 0 : index
    %c0_38 = arith.constant 0 : index
    %49 = vector.load %arg8[%c0_37, %c0_38] : memref<16x1xf32, #tpu.memory_space<vmem>>, vector<16x1xf32>
    %50 = vector.broadcast %49 : vector<16x1xf32> to vector<16x128xf32>
    %51 = arith.addf %48, %50 : vector<16x128xf32>
    %cst_39 = arith.constant 0.000000e+00 : f32
    %52 = vector.broadcast %cst_39 : f32 to vector<16x128xf32>
    %53 = arith.maximumf %51, %52 : vector<16x128xf32>
    %54 = math.absf %51 : vector<16x128xf32>
    %cst_40 = arith.constant 0.000000e+00 : f32
    %55 = vector.broadcast %cst_40 : f32 to vector<16x128xf32>
    %56 = arith.subf %55, %54 : vector<16x128xf32>
    %57 = math.exp %56 : vector<16x128xf32>
    %cst_41 = arith.constant 1.000000e+00 : f32
    %58 = vector.broadcast %cst_41 : f32 to vector<16x128xf32>
    %59 = arith.addf %58, %57 : vector<16x128xf32>
    %60 = math.log %59 : vector<16x128xf32>
    %61 = arith.addf %53, %60 : vector<16x128xf32>
    %c0_42 = arith.constant 0 : index
    %c0_43 = arith.constant 0 : index
    %62 = vector.load %arg9[%c0_42, %c0_43] : memref<128x128xf32, #tpu.memory_space<vmem>>, vector<128x128xf32>
    %cst_44 = arith.constant dense<0.000000e+00> : vector<16x128xf32>
    %63 = tpu.matmul %61, %62, %cst_44 {dimension_numbers = #tpu.dot_dimension_numbers<[1], [0], [0], [1], [0, 0, 1, 1], [], []>} : vector<16x128xf32>, vector<128x128xf32>, vector<16x128xf32> -> vector<16x128xf32>
    %c0_45 = arith.constant 0 : index
    %c0_46 = arith.constant 0 : index
    %64 = vector.load %arg11[%c0_45, %c0_46] : memref<1x10xf32, #tpu.memory_space<vmem>>, vector<1x10xf32>
    %65 = vector.extract_strided_slice %63 {offsets = [0, 0], sizes = [1, 128], strides = [1, 1]} : vector<16x128xf32> to vector<1x128xf32>
    %c0_47 = arith.constant 0 : index
    %c0_48 = arith.constant 0 : index
    %c0_49 = arith.constant 0 : index
    %66 = vector.load %arg10[%c0_47, %c0_48, %c0_49] : memref<16x128x10xf32, #tpu.memory_space<vmem>>, vector<1x128x10xf32>
    %67 = vector.shape_cast %66 : vector<1x128x10xf32> to vector<128x10xf32>
    %cst_50 = arith.constant dense<0.000000e+00> : vector<1x10xf32>
    %68 = tpu.matmul %65, %67, %cst_50 {dimension_numbers = #tpu.dot_dimension_numbers<[1], [0], [0], [1], [0, 0, 1, 1], [], []>} : vector<1x128xf32>, vector<128x10xf32>, vector<1x10xf32> -> vector<1x10xf32>
    %69 = arith.addf %64, %68 : vector<1x10xf32>
    %70 = vector.extract_strided_slice %63 {offsets = [1, 0], sizes = [1, 128], strides = [1, 1]} : vector<16x128xf32> to vector<1x128xf32>
    %c1_51 = arith.constant 1 : index
    %c0_52 = arith.constant 0 : index
    %c0_53 = arith.constant 0 : index
    %71 = vector.load %arg10[%c1_51, %c0_52, %c0_53] : memref<16x128x10xf32, #tpu.memory_space<vmem>>, vector<1x128x10xf32>
    %72 = vector.shape_cast %71 : vector<1x128x10xf32> to vector<128x10xf32>
    %cst_54 = arith.constant dense<0.000000e+00> : vector<1x10xf32>
    %73 = tpu.matmul %70, %72, %cst_54 {dimension_numbers = #tpu.dot_dimension_numbers<[1], [0], [0], [1], [0, 0, 1, 1], [], []>} : vector<1x128xf32>, vector<128x10xf32>, vector<1x10xf32> -> vector<1x10xf32>
    %74 = arith.addf %69, %73 : vector<1x10xf32>
    %75 = vector.extract_strided_slice %63 {offsets = [2, 0], sizes = [1, 128], strides = [1, 1]} : vector<16x128xf32> to vector<1x128xf32>
    %c2_55 = arith.constant 2 : index
    %c0_56 = arith.constant 0 : index
    %c0_57 = arith.constant 0 : index
    %76 = vector.load %arg10[%c2_55, %c0_56, %c0_57] : memref<16x128x10xf32, #tpu.memory_space<vmem>>, vector<1x128x10xf32>
    %77 = vector.shape_cast %76 : vector<1x128x10xf32> to vector<128x10xf32>
    %cst_58 = arith.constant dense<0.000000e+00> : vector<1x10xf32>
    %78 = tpu.matmul %75, %77, %cst_58 {dimension_numbers = #tpu.dot_dimension_numbers<[1], [0], [0], [1], [0, 0, 1, 1], [], []>} : vector<1x128xf32>, vector<128x10xf32>, vector<1x10xf32> -> vector<1x10xf32>
    %79 = arith.addf %74, %78 : vector<1x10xf32>
    %80 = vector.extract_strided_slice %63 {offsets = [3, 0], sizes = [1, 128], strides = [1, 1]} : vector<16x128xf32> to vector<1x128xf32>
    %c3 = arith.constant 3 : index
    %c0_59 = arith.constant 0 : index
    %c0_60 = arith.constant 0 : index
    %81 = vector.load %arg10[%c3, %c0_59, %c0_60] : memref<16x128x10xf32, #tpu.memory_space<vmem>>, vector<1x128x10xf32>
    %82 = vector.shape_cast %81 : vector<1x128x10xf32> to vector<128x10xf32>
    %cst_61 = arith.constant dense<0.000000e+00> : vector<1x10xf32>
    %83 = tpu.matmul %80, %82, %cst_61 {dimension_numbers = #tpu.dot_dimension_numbers<[1], [0], [0], [1], [0, 0, 1, 1], [], []>} : vector<1x128xf32>, vector<128x10xf32>, vector<1x10xf32> -> vector<1x10xf32>
    %84 = arith.addf %79, %83 : vector<1x10xf32>
    %85 = vector.extract_strided_slice %63 {offsets = [4, 0], sizes = [1, 128], strides = [1, 1]} : vector<16x128xf32> to vector<1x128xf32>
    %c4 = arith.constant 4 : index
    %c0_62 = arith.constant 0 : index
    %c0_63 = arith.constant 0 : index
    %86 = vector.load %arg10[%c4, %c0_62, %c0_63] : memref<16x128x10xf32, #tpu.memory_space<vmem>>, vector<1x128x10xf32>
    %87 = vector.shape_cast %86 : vector<1x128x10xf32> to vector<128x10xf32>
    %cst_64 = arith.constant dense<0.000000e+00> : vector<1x10xf32>
    %88 = tpu.matmul %85, %87, %cst_64 {dimension_numbers = #tpu.dot_dimension_numbers<[1], [0], [0], [1], [0, 0, 1, 1], [], []>} : vector<1x128xf32>, vector<128x10xf32>, vector<1x10xf32> -> vector<1x10xf32>
    %89 = arith.addf %84, %88 : vector<1x10xf32>
    %90 = vector.extract_strided_slice %63 {offsets = [5, 0], sizes = [1, 128], strides = [1, 1]} : vector<16x128xf32> to vector<1x128xf32>
    %c5 = arith.constant 5 : index
    %c0_65 = arith.constant 0 : index
    %c0_66 = arith.constant 0 : index
    %91 = vector.load %arg10[%c5, %c0_65, %c0_66] : memref<16x128x10xf32, #tpu.memory_space<vmem>>, vector<1x128x10xf32>
    %92 = vector.shape_cast %91 : vector<1x128x10xf32> to vector<128x10xf32>
    %cst_67 = arith.constant dense<0.000000e+00> : vector<1x10xf32>
    %93 = tpu.matmul %90, %92, %cst_67 {dimension_numbers = #tpu.dot_dimension_numbers<[1], [0], [0], [1], [0, 0, 1, 1], [], []>} : vector<1x128xf32>, vector<128x10xf32>, vector<1x10xf32> -> vector<1x10xf32>
    %94 = arith.addf %89, %93 : vector<1x10xf32>
    %95 = vector.extract_strided_slice %63 {offsets = [6, 0], sizes = [1, 128], strides = [1, 1]} : vector<16x128xf32> to vector<1x128xf32>
    %c6 = arith.constant 6 : index
    %c0_68 = arith.constant 0 : index
    %c0_69 = arith.constant 0 : index
    %96 = vector.load %arg10[%c6, %c0_68, %c0_69] : memref<16x128x10xf32, #tpu.memory_space<vmem>>, vector<1x128x10xf32>
    %97 = vector.shape_cast %96 : vector<1x128x10xf32> to vector<128x10xf32>
    %cst_70 = arith.constant dense<0.000000e+00> : vector<1x10xf32>
    %98 = tpu.matmul %95, %97, %cst_70 {dimension_numbers = #tpu.dot_dimension_numbers<[1], [0], [0], [1], [0, 0, 1, 1], [], []>} : vector<1x128xf32>, vector<128x10xf32>, vector<1x10xf32> -> vector<1x10xf32>
    %99 = arith.addf %94, %98 : vector<1x10xf32>
    %100 = vector.extract_strided_slice %63 {offsets = [7, 0], sizes = [1, 128], strides = [1, 1]} : vector<16x128xf32> to vector<1x128xf32>
    %c7 = arith.constant 7 : index
    %c0_71 = arith.constant 0 : index
    %c0_72 = arith.constant 0 : index
    %101 = vector.load %arg10[%c7, %c0_71, %c0_72] : memref<16x128x10xf32, #tpu.memory_space<vmem>>, vector<1x128x10xf32>
    %102 = vector.shape_cast %101 : vector<1x128x10xf32> to vector<128x10xf32>
    %cst_73 = arith.constant dense<0.000000e+00> : vector<1x10xf32>
    %103 = tpu.matmul %100, %102, %cst_73 {dimension_numbers = #tpu.dot_dimension_numbers<[1], [0], [0], [1], [0, 0, 1, 1], [], []>} : vector<1x128xf32>, vector<128x10xf32>, vector<1x10xf32> -> vector<1x10xf32>
    %104 = arith.addf %99, %103 : vector<1x10xf32>
    %105 = vector.extract_strided_slice %63 {offsets = [8, 0], sizes = [1, 128], strides = [1, 1]} : vector<16x128xf32> to vector<1x128xf32>
    %c8 = arith.constant 8 : index
    %c0_74 = arith.constant 0 : index
    %c0_75 = arith.constant 0 : index
    %106 = vector.load %arg10[%c8, %c0_74, %c0_75] : memref<16x128x10xf32, #tpu.memory_space<vmem>>, vector<1x128x10xf32>
    %107 = vector.shape_cast %106 : vector<1x128x10xf32> to vector<128x10xf32>
    %cst_76 = arith.constant dense<0.000000e+00> : vector<1x10xf32>
    %108 = tpu.matmul %105, %107, %cst_76 {dimension_numbers = #tpu.dot_dimension_numbers<[1], [0], [0], [1], [0, 0, 1, 1], [], []>} : vector<1x128xf32>, vector<128x10xf32>, vector<1x10xf32> -> vector<1x10xf32>
    %109 = arith.addf %104, %108 : vector<1x10xf32>
    %110 = vector.extract_strided_slice %63 {offsets = [9, 0], sizes = [1, 128], strides = [1, 1]} : vector<16x128xf32> to vector<1x128xf32>
    %c9 = arith.constant 9 : index
    %c0_77 = arith.constant 0 : index
    %c0_78 = arith.constant 0 : index
    %111 = vector.load %arg10[%c9, %c0_77, %c0_78] : memref<16x128x10xf32, #tpu.memory_space<vmem>>, vector<1x128x10xf32>
    %112 = vector.shape_cast %111 : vector<1x128x10xf32> to vector<128x10xf32>
    %cst_79 = arith.constant dense<0.000000e+00> : vector<1x10xf32>
    %113 = tpu.matmul %110, %112, %cst_79 {dimension_numbers = #tpu.dot_dimension_numbers<[1], [0], [0], [1], [0, 0, 1, 1], [], []>} : vector<1x128xf32>, vector<128x10xf32>, vector<1x10xf32> -> vector<1x10xf32>
    %114 = arith.addf %109, %113 : vector<1x10xf32>
    %115 = vector.extract_strided_slice %63 {offsets = [10, 0], sizes = [1, 128], strides = [1, 1]} : vector<16x128xf32> to vector<1x128xf32>
    %c10 = arith.constant 10 : index
    %c0_80 = arith.constant 0 : index
    %c0_81 = arith.constant 0 : index
    %116 = vector.load %arg10[%c10, %c0_80, %c0_81] : memref<16x128x10xf32, #tpu.memory_space<vmem>>, vector<1x128x10xf32>
    %117 = vector.shape_cast %116 : vector<1x128x10xf32> to vector<128x10xf32>
    %cst_82 = arith.constant dense<0.000000e+00> : vector<1x10xf32>
    %118 = tpu.matmul %115, %117, %cst_82 {dimension_numbers = #tpu.dot_dimension_numbers<[1], [0], [0], [1], [0, 0, 1, 1], [], []>} : vector<1x128xf32>, vector<128x10xf32>, vector<1x10xf32> -> vector<1x10xf32>
    %119 = arith.addf %114, %118 : vector<1x10xf32>
    %120 = vector.extract_strided_slice %63 {offsets = [11, 0], sizes = [1, 128], strides = [1, 1]} : vector<16x128xf32> to vector<1x128xf32>
    %c11 = arith.constant 11 : index
    %c0_83 = arith.constant 0 : index
    %c0_84 = arith.constant 0 : index
    %121 = vector.load %arg10[%c11, %c0_83, %c0_84] : memref<16x128x10xf32, #tpu.memory_space<vmem>>, vector<1x128x10xf32>
    %122 = vector.shape_cast %121 : vector<1x128x10xf32> to vector<128x10xf32>
    %cst_85 = arith.constant dense<0.000000e+00> : vector<1x10xf32>
    %123 = tpu.matmul %120, %122, %cst_85 {dimension_numbers = #tpu.dot_dimension_numbers<[1], [0], [0], [1], [0, 0, 1, 1], [], []>} : vector<1x128xf32>, vector<128x10xf32>, vector<1x10xf32> -> vector<1x10xf32>
    %124 = arith.addf %119, %123 : vector<1x10xf32>
    %125 = vector.extract_strided_slice %63 {offsets = [12, 0], sizes = [1, 128], strides = [1, 1]} : vector<16x128xf32> to vector<1x128xf32>
    %c12 = arith.constant 12 : index
    %c0_86 = arith.constant 0 : index
    %c0_87 = arith.constant 0 : index
    %126 = vector.load %arg10[%c12, %c0_86, %c0_87] : memref<16x128x10xf32, #tpu.memory_space<vmem>>, vector<1x128x10xf32>
    %127 = vector.shape_cast %126 : vector<1x128x10xf32> to vector<128x10xf32>
    %cst_88 = arith.constant dense<0.000000e+00> : vector<1x10xf32>
    %128 = tpu.matmul %125, %127, %cst_88 {dimension_numbers = #tpu.dot_dimension_numbers<[1], [0], [0], [1], [0, 0, 1, 1], [], []>} : vector<1x128xf32>, vector<128x10xf32>, vector<1x10xf32> -> vector<1x10xf32>
    %129 = arith.addf %124, %128 : vector<1x10xf32>
    %130 = vector.extract_strided_slice %63 {offsets = [13, 0], sizes = [1, 128], strides = [1, 1]} : vector<16x128xf32> to vector<1x128xf32>
    %c13 = arith.constant 13 : index
    %c0_89 = arith.constant 0 : index
    %c0_90 = arith.constant 0 : index
    %131 = vector.load %arg10[%c13, %c0_89, %c0_90] : memref<16x128x10xf32, #tpu.memory_space<vmem>>, vector<1x128x10xf32>
    %132 = vector.shape_cast %131 : vector<1x128x10xf32> to vector<128x10xf32>
    %cst_91 = arith.constant dense<0.000000e+00> : vector<1x10xf32>
    %133 = tpu.matmul %130, %132, %cst_91 {dimension_numbers = #tpu.dot_dimension_numbers<[1], [0], [0], [1], [0, 0, 1, 1], [], []>} : vector<1x128xf32>, vector<128x10xf32>, vector<1x10xf32> -> vector<1x10xf32>
    %134 = arith.addf %129, %133 : vector<1x10xf32>
    %135 = vector.extract_strided_slice %63 {offsets = [14, 0], sizes = [1, 128], strides = [1, 1]} : vector<16x128xf32> to vector<1x128xf32>
    %c14 = arith.constant 14 : index
    %c0_92 = arith.constant 0 : index
    %c0_93 = arith.constant 0 : index
    %136 = vector.load %arg10[%c14, %c0_92, %c0_93] : memref<16x128x10xf32, #tpu.memory_space<vmem>>, vector<1x128x10xf32>
    %137 = vector.shape_cast %136 : vector<1x128x10xf32> to vector<128x10xf32>
    %cst_94 = arith.constant dense<0.000000e+00> : vector<1x10xf32>
    %138 = tpu.matmul %135, %137, %cst_94 {dimension_numbers = #tpu.dot_dimension_numbers<[1], [0], [0], [1], [0, 0, 1, 1], [], []>} : vector<1x128xf32>, vector<128x10xf32>, vector<1x10xf32> -> vector<1x10xf32>
    %139 = arith.addf %134, %138 : vector<1x10xf32>
    %140 = vector.extract_strided_slice %63 {offsets = [15, 0], sizes = [1, 128], strides = [1, 1]} : vector<16x128xf32> to vector<1x128xf32>
    %c15 = arith.constant 15 : index
    %c0_95 = arith.constant 0 : index
    %c0_96 = arith.constant 0 : index
    %141 = vector.load %arg10[%c15, %c0_95, %c0_96] : memref<16x128x10xf32, #tpu.memory_space<vmem>>, vector<1x128x10xf32>
    %142 = vector.shape_cast %141 : vector<1x128x10xf32> to vector<128x10xf32>
    %cst_97 = arith.constant dense<0.000000e+00> : vector<1x10xf32>
    %143 = tpu.matmul %140, %142, %cst_97 {dimension_numbers = #tpu.dot_dimension_numbers<[1], [0], [0], [1], [0, 0, 1, 1], [], []>} : vector<1x128xf32>, vector<128x10xf32>, vector<1x10xf32> -> vector<1x10xf32>
    %144 = arith.addf %139, %143 : vector<1x10xf32>
    %145 = vector.shape_cast %144 : vector<1x10xf32> to vector<1x1x10xf32>
    %c0_98 = arith.constant 0 : index
    %c0_99 = arith.constant 0 : index
    %c0_100 = arith.constant 0 : index
    %146 = vector.load %arg12[%c0_98, %c0_99, %c0_100] : memref<1x1x10xf32, #tpu.memory_space<vmem>>, vector<1x1x10xf32>
    tpu.vector_store %arg12[%c0_98, %c0_99, %c0_100], %145 {strides = array<i32>} : memref<1x1x10xf32, #tpu.memory_space<vmem>>, vector<1x1x10xf32>,
    return
  }
  func.func @transform_0(%arg0: i32) -> (i32, i32, i32) {
    %c0_i32 = arith.constant 0 : i32
    %c0_i32_0 = arith.constant 0 : i32
    %c0_i32_1 = arith.constant 0 : i32
    return %arg0, %c0_i32, %c0_i32_0 : i32, i32, i32
  }
  func.func @transform_1(%arg0: i32) -> (i32, i32) {
    %c0_i32 = arith.constant 0 : i32
    %c0_i32_0 = arith.constant 0 : i32
    %c0_i32_1 = arith.constant 0 : i32
    return %c0_i32, %c0_i32_0 : i32, i32
  }
  func.func @transform_2(%arg0: i32) -> (i32, i32, i32) {
    %c0_i32 = arith.constant 0 : i32
    %c0_i32_0 = arith.constant 0 : i32
    %c0_i32_1 = arith.constant 0 : i32
    %c0_i32_2 = arith.constant 0 : i32
    return %c0_i32, %c0_i32_0, %c0_i32_1 : i32, i32, i32
  }
  func.func @transform_3(%arg0: i32) -> (i32, i32) {
    %c0_i32 = arith.constant 0 : i32
    %c0_i32_0 = arith.constant 0 : i32
    %c0_i32_1 = arith.constant 0 : i32
    return %c0_i32, %c0_i32_0 : i32, i32
  }
  func.func @transform_4(%arg0: i32) -> (i32, i32) {
    %c0_i32 = arith.constant 0 : i32
    %c0_i32_0 = arith.constant 0 : i32
    %c0_i32_1 = arith.constant 0 : i32
    return %c0_i32, %c0_i32_0 : i32, i32
  }
  func.func @transform_5(%arg0: i32) -> (i32, i32) {
    %c0_i32 = arith.constant 0 : i32
    %c0_i32_0 = arith.constant 0 : i32
    %c0_i32_1 = arith.constant 0 : i32
    return %c0_i32, %c0_i32_0 : i32, i32
  }
  func.func @transform_6(%arg0: i32) -> (i32, i32, i32) {
    %c0_i32 = arith.constant 0 : i32
    %c0_i32_0 = arith.constant 0 : i32
    %c0_i32_1 = arith.constant 0 : i32
    %c0_i32_2 = arith.constant 0 : i32
    return %c0_i32, %c0_i32_0, %c0_i32_1 : i32, i32, i32
  }
  func.func @transform_7(%arg0: i32) -> (i32, i32) {
    %c0_i32 = arith.constant 0 : i32
    %c0_i32_0 = arith.constant 0 : i32
    %c0_i32_1 = arith.constant 0 : i32
    return %c0_i32, %c0_i32_0 : i32, i32
  }
  func.func @transform_8(%arg0: i32) -> (i32, i32) {
    %c0_i32 = arith.constant 0 : i32
    %c0_i32_0 = arith.constant 0 : i32
    %c0_i32_1 = arith.constant 0 : i32
    return %c0_i32, %c0_i32_0 : i32, i32
  }
  func.func @transform_9(%arg0: i32) -> (i32, i32, i32) {
    %c0_i32 = arith.constant 0 : i32
    %c0_i32_0 = arith.constant 0 : i32
    %c0_i32_1 = arith.constant 0 : i32
    %c0_i32_2 = arith.constant 0 : i32
    return %c0_i32, %c0_i32_0, %c0_i32_1 : i32, i32, i32
  }
  func.func @transform_10(%arg0: i32) -> (i32, i32) {
    %c0_i32 = arith.constant 0 : i32
    %c0_i32_0 = arith.constant 0 : i32
    %c0_i32_1 = arith.constant 0 : i32
    return %c0_i32, %c0_i32_0 : i32, i32
  }
  func.func @transform_11(%arg0: i32) -> (i32, i32, i32) {
    %c0_i32 = arith.constant 0 : i32
    %c0_i32_0 = arith.constant 0 : i32
    %c0_i32_1 = arith.constant 0 : i32
    return %arg0, %c0_i32, %c0_i32_0 : i32, i32, i32
  }
}

</mosaic_0001>

<bundles_post_ra>
// kernel: tpu_custom_call.1
= control target key start
LH: loop header
LB: loop body
LE: loop exit
PB: predicated region body
PF: predicated region fallthrough
CT: control target
= control target key end

     0   :  { %s6365_s0 = inlined_call_operand.vmem [shape: f32[2,4,16], index: 0, kind: input, shape index: {}]   ;;  %s6366_s1 = inlined_call_operand.vmem [shape: f32[16,384], index: 1, kind: input, shape index: {}]   ;;  %s6367_s2 = inlined_call_operand.vmem [shape: f32[3,8,4], index: 2, kind: input, shape index: {}]   ;;  %s6368_s3 = inlined_call_operand.vmem [shape: f32[8,1], index: 3, kind: input, shape index: {}]   ;;  %s6369_s4 = inlined_call_operand.vmem [shape: f32[128,128], index: 4, kind: input, shape index: {}]   ;;  %s6370_s5 = inlined_call_operand.vmem [shape: f32[128,384], index: 5, kind: input, shape index: {}]   ;;  %s6371_s6 = inlined_call_operand.vmem [shape: f32[3,16,8], index: 6, kind: input, shape index: {}]   ;;  %s6372_s7 = inlined_call_operand.vmem [shape: f32[16,1], index: 7, kind: input, shape index: {}]   ;;  %s6373_s8 = inlined_call_operand.vmem [shape: f32[128,128], index: 8, kind: input, shape index: {}]   ;;  %s6374_s9 = inlined_call_operand.vmem [shape: f32[16,128,10], index: 9, kind: input, shape index: {}]   ;;  %s6375_s10 = inlined_call_operand.vmem [shape: f32[1,10], index: 10, kind: input, shape index: {}]   ;;  %s6376_s11 = inlined_call_operand.hbm [shape: f32[2,1,10], index: 11, kind: output, shape index: {}]  }
   0x1   :  { %6377 = sst [smem:[#allocation5_spill]] %s6365_s0 }
   0x2   :  { %16 = vsyncpa [#allocation3], 0 }
   0x3   :  { %18 = vsyncpa [#allocation3 + $0x1], 0  ;;  %s4980_s17 = smov 0   ;;  %s4982_s18 = smov 0  }
   0x4   :  { %s4984_s19 = smov 0   ;;  %s4986_s20 = smov 0  }
   0x5 LB: > { %s5001_s21 = sadd.s32 4294967295, %s4913_s20   ;;  %s2945_s22 = sadd.s32 4294967294, %s4913_s20   ;;  %s4913_s20 = sphi %s4986_s20, %s6384_s20   ;;  %s4909_s19 = sphi %s4984_s19, %s6383_s19   ;;  %s4905_s18 = sphi %s4982_s18, %s6382_s18   ;;  %s4901_s17 = sphi %s4980_s17, %s6381_s17  }
   0x6   : > { %s5005_s23 = sadd.s32 1, %s4913_s20   ;;  %s267_s24 = sadd.s32 1, %s4909_s19 }
   0x7   : > { %s264_s25 = ssub.s32 %s4913_s20, %s5005_s23  ;;  %p277_p0 = scmp.ne.s32.totalorder %s4909_s19, %s4905_s18 }
   0x8   : > { %p265_p1 = scmp.eq.s32.totalorder %s264_s25, 0  ;;  %p278_p2 = scmp.eq.s32.totalorder %s5001_s21, 1 }
   0x9   : > { %p283_p3 = scmp.ne.s32.totalorder %s4905_s18, %s4901_s17  ;;  %p284_p4 = scmp.eq.s32.totalorder %s2945_s22, 1 }
   0xa   : > { %s5016_s26 = scalar_select %p265_p1, %s4909_s19, %s267_s24  }
   0xb   : > { %p5018_p5 = por %p278_p2, %p277_p0  ;;  %p5022_p6 = por %p284_p4, %p283_p3 }
   0xc   : > { %p2948_p7 = scmp.ge.s32.totalorder %s4913_s20, 1  ;;  %p339_p8 = scmp.lt.s32.totalorder %s4913_s20, 3 }
   0xe   : > { %p340_p9 = pnand %p2948_p7, %p339_p8 }
   0xf   : > { %v383_v0 = vld [vmem:[%s6366_s1 + $0x8] sm:$0xff] (!%p340_p9)  ;;  %v386_v1 = vld [vmem:[%s6366_s1 + $0x20] sm:$0xff] (!%p340_p9)  ;;  %p377_p10 = scmp.lt.s32.totalorder (!%p340_p9), %s5001_s21, 1  ;;  %v385_v4 = vld [vmem:[%s6366_s1 + $0x18] sm:$0xff] (!%p340_p9)  ;;  %v4915_v5 = vmov (!%p340_p9), 0.0   ;;  %vm4916_vm0 = vmmov (!%p340_p9), 0  }
  0x10   : > { %343 = sbr.rel (%p340_p9) target bundleno = 1937 (0x791), region = 64  ;;  %v382_v2 = vld [vmem:[%s6366_s1] sm:$0xff] (!%p340_p9)  ;;  %v4257_v3 = vpack.c.bf16 (!%p340_p9), %v386_v1, %v383_v0  ;;  %456 = vmatprep.mubr.f32.mxu1 (!%p340_p9), %v4915_v5  ;;  %v384_v6 = vld [vmem:[%s6366_s1 + $0x10] sm:$0xff] (!%p340_p9)  ;;  %v387_v7 = vld [vmem:[%s6366_s1 + $0x28] sm:$0xff] (!%p340_p9)  ;;  %3572 = vmatprep.subr.mxu0 (!%p340_p9), %v4915_v5  ;;  %vm388_vm1 = vcmask (!%p340_p9), 130048   ;;  %s6380_s0 = sld [smem:[#allocation5_spill]] (!%p340_p9) }
  0x11   : > { %v4259_v8 = vpack.c.bf16 (!%p340_p9), %v385_v4, %v382_v2  ;;  %3574 = vmatprep.mubr.msk.f32.mxu0 (!%p340_p9), %vm4916_vm0, %v4915_v5  ;;  %v4262_v9 = vpack.c.bf16 (!%p340_p9), %v387_v7, %v384_v6  ;;  %v4917_v10 = vmov (!%p340_p9), 0.0|0.0   ;;  %v769_v12 = vld [vmem:[%s6368_s3] sm:$0xff] (!%p340_p9)  ;;  %v4918_v13 = vmov (!%p340_p9), 0   ;;  %v2952_v16 = vld [vmem:[%s6367_s2 + $0x8] sm:$0xff] (!%p340_p9)  ;;  %v2957_v18 = vld [vmem:[%s6367_s2 + $0x10] sm:$0xff] (!%p340_p9)  ;;  %s4919_s14 = smov (!%p340_p9), [#allocation2]  }
  0x12   : > { %4258 = vmatprep.subr.bf16.mxu1 (!%p340_p9), %v4257_v3  ;;  %4837 = vset.pattern.permute.xlu0 (!%p340_p9), %v4918_v13  ;;  %v1314_v14 = vld [vmem:[%s6372_s7] sm:$0xff] (!%p340_p9)  ;;  %vm540_vm2 = vcmask (!%p340_p9), 1043456   ;;  %vm536_vm3 = vcmask (!%p340_p9), 31744   ;;  %v786_v23 = vld [vmem:[%s6369_s4 + $0x8] sm:$0xff] (!%p340_p9)  ;;  %v787_v25 = vld [vmem:[%s6369_s4 + $0x10] sm:$0xff] (!%p340_p9)  ;;  %vm1065_vm4 = vcmask (!%p340_p9), 64512  }
  0x13   : > { %4260 = vmatpush1.bf16.msra.mxu1 (!%p340_p9), %v4259_v8  ;;  %4838 = vset.pattern.permute.xlu1 (!%p340_p9), %v4918_v13  ;;  %v533_v20 = vld [vmem:[%s6367_s2] sm:$0xff] (!%p340_p9)  ;;  %v788_v26 = vld [vmem:[%s6369_s4 + $0x18] sm:$0xff] (!%p340_p9)  ;;  %v790_v29 = vld [vmem:[%s6369_s4 + $0x28] sm:$0xff] (!%p340_p9)  ;;  %vm2875_vm5 = vcmask (!%p340_p9), 73728   ;;  %s4855_s15 = sshll.u32 (!%p340_p9), %s4919_s14, 4  ;;  %s4856_s15 = int_to_ptr.vmem [resolvable:$false] %s4855_s15 }
  0x14   : > { %4261 = vmatprep.subr.bf16.mxu1 (!%p340_p9), %v4917_v10  ;;  %772 = vperm.xlu0 (!%p340_p9), %4837, %v769_v12   ;;  %v785_v22 = vld [vmem:[%s6369_s4] sm:$0xff] (!%p340_p9)  ;;  %v4268_v27 = vpack.c.bf16 (!%p340_p9), %v788_v26, %v787_v25  ;;  %v791_v31 = vld [vmem:[%s6369_s4 + $0x30] sm:$0xff] (!%p340_p9)  ;;  %v792_v32 = vld [vmem:[%s6369_s4 + $0x38] sm:$0xff] (!%p340_p9) }
  0x15   : > { %v4265_v24 = vpack.c.bf16 (!%p340_p9), %v786_v23, %v785_v22  ;;  %v789_v28 = vld [vmem:[%s6369_s4 + $0x20] sm:$0xff] (!%p340_p9)  ;;  %v4274_v33 = vpack.c.bf16 (!%p340_p9), %v792_v32, %v791_v31  ;;  %v794_v35 = vld [vmem:[%s6369_s4 + $0x48] sm:$0xff] (!%p340_p9)  ;;  %v795_v37 = vld [vmem:[%s6369_s4 + $0x50] sm:$0xff] (!%p340_p9) }
  0x16   : > { %v4271_v30 = vpack.c.bf16 (!%p340_p9), %v790_v29, %v789_v28  ;;  %v793_v34 = vld [vmem:[%s6369_s4 + $0x40] sm:$0xff] (!%p340_p9)  ;;  %v796_v38 = vld [vmem:[%s6369_s4 + $0x58] sm:$0xff] (!%p340_p9)  ;;  %v798_v41 = vld [vmem:[%s6369_s4 + $0x68] sm:$0xff] (!%p340_p9) }
  0x17   : > { %s378_s12 = scalar_select %p377_p10, %s5001_s21, 1  ;;  %v4277_v36 = vpack.c.bf16 %v794_v35, %v793_v34  ;;  %v4280_v39 = vpack.c.bf16 %v796_v38, %v795_v37  ;;  %v797_v40 = vld [vmem:[%s6369_s4 + $0x60] sm:$0xff]  ;;  %v799_v43 = vld [vmem:[%s6369_s4 + $0x70] sm:$0xff]  ;;  %v800_v44 = vld [vmem:[%s6369_s4 + $0x78] sm:$0xff] }
  0x18   : > { %1318 = vperm.xlu0 %4837, %v1314_v14   ;;  %v4283_v42 = vpack.c.bf16 %v798_v41, %v797_v40  ;;  %v4286_v45 = vpack.c.bf16 %v800_v44, %v799_v43  ;;  %v872_v46 = vld [vmem:[%s6370_s5 + $0x8] sm:$0xff]  ;;  %v875_v47 = vld [vmem:[%s6370_s5 + $0x20] sm:$0xff]  ;;  %v874_v1 = vld [vmem:[%s6370_s5 + $0x18] sm:$0xff] }
  0x19   : > { %s2949_s13 = sshll.u32 %s378_s12, 2  ;;  %v4288_v48 = vpack.c.bf16 %v875_v47, %v872_v46  ;;  %v871_v0 = vld [vmem:[%s6370_s5] sm:$0xff]  ;;  %v878_v3 = vld [vmem:[%s6370_s5 + $0x38] sm:$0xff]  ;;  %v881_v4 = vld [vmem:[%s6370_s5 + $0x50] sm:$0xff] }
  0x1a   : > { %s380_s16 = scalar_lea.vmem %s6380_s0, %s2949_s13  ;;  %v4290_v8 = vpack.c.bf16 %v874_v1, %v871_v0  ;;  %v877_v12 = vld [vmem:[%s6370_s5 + $0x30] sm:$0xff]  ;;  %v880_v13 = vld [vmem:[%s6370_s5 + $0x48] sm:$0xff]  ;;  %v898_v31 = vld [vmem:[%s6370_s5 + $0xd8] sm:$0xff]  ;;  %s375_s13 = sand.u32 1, %s4905_s18  }
  0x1b   : > { %v381_v11 = vld [vmem:[%s380_s16] sm:$0xf]  ;;  %v884_v14 = vld [vmem:[%s6370_s5 + $0x68] sm:$0xff]  ;;  %v902_v32 = vld [vmem:[%s6370_s5 + $0xf8] sm:$0xff]  ;;  %s3210_s16 = sshll.u32 %s5001_s21, 4  ;;  %s376_s22 = scalar_lea.vmem [#allocation2], %s375_s13 }
  0x1c   : > { %2950 = vmatmul.mubr.msk.f32.vlgmr.msra.gmra.mrb[0].mxu1 %vm388_vm1, %v381_v11  ;;  %v892_v25 = vld [vmem:[%s6370_s5 + $0xa8] sm:$0xff]  ;;  %v910_v43 = vld [vmem:[%s6370_s5 + $0x138] sm:$0xff]  ;;  %v897_v1 = vld [vmem:[%s6370_s5 + $0xd0] sm:$0xff]  ;;  %s2890_s24 = sshll.u32 %s376_s22, 4  ;;  %s6323_s30 = scalar_lea.hbm %s6376_s11, %s3210_s16  ;;  %s6325_s24 = int_to_ptr.vmem [resolvable:$true] %s2890_s24 }
  0x1d   : > { %4263 = vmatpush3.bf16.msra.mxu1 %v4262_v9  ;;  %3559 = vmatprep.mubr.msk.f32.mxu1 %vm4916_vm0, %v4915_v5  ;;  %v896_v26 = vld [vmem:[%s6370_s5 + $0xc8] sm:$0xff]  ;;  %v914_v44 = vld [vmem:[%s6370_s5 + $0x158] sm:$0xff]  ;;  %s2878_s12 = scalar_lea.sflag [#allocation3], %s375_s13  ;;  %s4851_s21 = scalar_lea.vmem %s6325_s24, 16 }
  0x1e   : > { %3562 = vmatprep.subr.mxu1 %v4915_v5  ;;  %v904_v37 = vld [vmem:[%s6370_s5 + $0x108] sm:$0xff]  ;;  %p4852_p11 = scmp.ne.s32.totalorder %s6325_s24, %s4851_s21  ;;  %s4857_s0 = scalar_lea.vmem %s4856_s15, 32 }
  0x1f   : > { %v908_v38 = vld [vmem:[%s6370_s5 + $0x128] sm:$0xff]  ;;  %p4858_p0 = scmp.lt.s32.totalorder %s6325_s24, %s4856_s15  ;;  %p4859_p1 = scmp.lt.s32.totalorder %s4857_s0, %s4851_s21 }
  0x20   : > { %3560 = vmatmul.mubr.msk.f32.vlgmr.msra.gmra.mrb[2].mxu1 %vm388_vm1, %v381_v11  ;;  %v4292_v11 = vpack.c.bf16 %v881_v4, %v878_v3  ;;  %v903_v4 = vld [vmem:[%s6370_s5 + $0x100] sm:$0xff]  ;;  %p4853_p12 = pnand %p4852_p11, %p5018_p5 }
  0x21   : > { %3564 = vmatprep.mubr.msk.f32.mxu1 %vm4916_vm0, %v4915_v5  ;;  %p4860_p2 = por %p4859_p1, %p4858_p0 }
  0x22   : > { %p4854_p13 = pneg %p4853_p12 }
  0x24   : > { %p4861_p3 = pnand %p4860_p2, %p4854_p13 }
  0x93   : > { %v773_v57 = vpop.permute.xlu0 %772 }
  0xef   : > { %v458_v15 = vpop.f32.mrb[0].mxu1 }
  0xf0   : > { %v460_v17 = vpop.f32.mrb[1].mxu1 }
  0xf1   : > { %3563 = vmatpush3.msk.msra.mxu1 %vm540_vm2, %v460_v17 }
  0xf2   : > { %3565 = vmatmul.mubr.msk.f32.vlgmr.msra.gmra.mrb[4].mxu1 %vm536_vm3, %v2952_v16  ;;  %3567 = vmatprep.subr.mxu1 %v4915_v5  ;;  %v4294_v16 = vpack.c.bf16 %v880_v13, %v877_v12  ;;  %v915_v12 = vld [vmem:[%s6370_s5 + $0x160] sm:$0xff]  ;;  %v918_v13 = vld [vmem:[%s6370_s5 + $0x178] sm:$0xff] }
  0xf3   : > { %3568 = vmatpush3.msk.msra.mxu1 %vm540_vm2, %v458_v15  ;;  %v529_v19 = vpop.f32.mrb[2].mxu1  ;;  %3569 = vmatprep.mubr.msk.f32.mxu1 %vm4916_vm0, %v4915_v5  ;;  %v887_v15 = vld [vmem:[%s6370_s5 + $0x80] sm:$0xff] }
  0xf4   : > { %v3561_v21 = vpop.f32.mrb[3].mxu1  ;;  %3573 = vmatpush3.msk.msra.mxu0 %vm540_vm2, %v529_v19  ;;  %4520 = vmatprep.subr.bf16.mxu1 %v4917_v10  ;;  %v4296_v17 = vpack.c.bf16 %v887_v15, %v884_v14  ;;  %v886_v19 = vld [vmem:[%s6370_s5 + $0x78] sm:$0xff]  ;;  %v4342_v14 = vpack.c.bf16 %v918_v13, %v915_v12  ;;  %v2960_v15 = vld [vmem:[%s6371_s6 + $0x10] sm:$0xff] }
  0xf5   : > { %3575 = vmatmul.mubr.msk.f32.vlgmr.msra.gmra.mrb[0].mxu0 %vm536_vm3, %v2957_v18  ;;  %4264 = vmatprep.subr.bf16.mxu0 %v4917_v10  ;;  %v883_v18 = vld [vmem:[%s6370_s5 + $0x60] sm:$0xff]  ;;  %v893_v21 = vld [vmem:[%s6370_s5 + $0xb0] sm:$0xff] }
  0xf6   : > { %3570 = vmatmul.mubr.msk.f32.vlgmr.msra.gmra.mrb[6].mxu1 %vm536_vm3, %v533_v20  ;;  %3609 = vmatprep.mubr.msk.f32.mxu0 %vm4916_vm0, %v4915_v5  ;;  %v890_v20 = vld [vmem:[%s6370_s5 + $0x98] sm:$0xff]  ;;  %v4298_v22 = vpack.c.bf16 %v886_v19, %v883_v18 }
  0xf7   : > { %3939 = vmatprep.mubr.msk.f32.mxu1 %vm4916_vm0, %v4915_v5  ;;  %4266 = vmatpush3.bf16.msra.mxu0 %v4265_v24  ;;  %v4300_v23 = vpack.c.bf16 %v893_v21, %v890_v20  ;;  %v889_v24 = vld [vmem:[%s6370_s5 + $0x90] sm:$0xff]  ;;  %v2961_v19 = vld [vmem:[%s6371_s6 + $0x18] sm:$0xff]  ;;  %v1060_v20 = vld [vmem:[%s6371_s6] sm:$0xff] }
  0xf8   : > { %4267 = vmatprep.subr.bf16.mxu0 %v4917_v10  ;;  %v4302_v28 = vpack.c.bf16 %v892_v25, %v889_v24  ;;  %v1061_v21 = vld [vmem:[%s6371_s6 + $0x8] sm:$0xff] }
  0xf9   : > { %v2967_v24 = vld [vmem:[%s6371_s6 + $0x28] sm:$0xff] }
  0xfb   : > { %4269 = vmatpush3.bf16.msra.mxu0 %v4268_v27  ;;  %v899_v27 = vld [vmem:[%s6370_s5 + $0xe0] sm:$0xff] }
  0xfc   : > { %4270 = vmatprep.subr.bf16.mxu0 %v4917_v10  ;;  %v4304_v29 = vpack.c.bf16 %v899_v27, %v896_v26  ;;  %v1346_v26 = vld [vmem:[%s6373_s8] sm:$0xff]  ;;  %v1347_v27 = vld [vmem:[%s6373_s8 + $0x8] sm:$0xff] }
  0xff   : > { %4272 = vmatpush3.bf16.msra.mxu0 %v4271_v30  ;;  %v895_v30 = vld [vmem:[%s6370_s5 + $0xc0] sm:$0xff] }
 0x100   : > { %4273 = vmatprep.subr.bf16.mxu0 %v4917_v10  ;;  %v4306_v34 = vpack.c.bf16 %v898_v31, %v895_v30  ;;  %v1349_v30 = vld [vmem:[%s6373_s8 + $0x18] sm:$0xff] }
 0x103   : > { %4275 = vmatpush3.bf16.msra.mxu0 %v4274_v33  ;;  %v905_v33 = vld [vmem:[%s6370_s5 + $0x110] sm:$0xff] }
 0x104   : > { %4276 = vmatprep.subr.bf16.mxu0 %v4917_v10  ;;  %v4308_v35 = vpack.c.bf16 %v905_v33, %v902_v32  ;;  %v1350_v32 = vld [vmem:[%s6373_s8 + $0x20] sm:$0xff]  ;;  %v1351_v33 = vld [vmem:[%s6373_s8 + $0x28] sm:$0xff] }
 0x107   : > { %4278 = vmatpush3.bf16.msra.mxu0 %v4277_v36  ;;  %v901_v36 = vld [vmem:[%s6370_s5 + $0xf0] sm:$0xff] }
 0x108   : > { %4279 = vmatprep.subr.bf16.mxu0 %v4917_v10  ;;  %v4310_v40 = vpack.c.bf16 %v904_v37, %v901_v36  ;;  %v1353_v36 = vld [vmem:[%s6373_s8 + $0x38] sm:$0xff] }
 0x10b   : > { %4281 = vmatpush3.bf16.msra.mxu0 %v4280_v39  ;;  %v911_v39 = vld [vmem:[%s6370_s5 + $0x140] sm:$0xff] }
 0x10c   : > { %4282 = vmatprep.subr.bf16.mxu0 %v4917_v10  ;;  %v4312_v41 = vpack.c.bf16 %v911_v39, %v908_v38  ;;  %v1354_v38 = vld [vmem:[%s6373_s8 + $0x40] sm:$0xff]  ;;  %v1355_v39 = vld [vmem:[%s6373_s8 + $0x48] sm:$0xff] }
 0x10f   : > { %4284 = vmatpush3.bf16.msra.mxu0 %v4283_v42  ;;  %v907_v42 = vld [vmem:[%s6370_s5 + $0x120] sm:$0xff] }
 0x110   : > { %4285 = vmatprep.subr.bf16.mxu0 %v4917_v10  ;;  %v4314_v46 = vpack.c.bf16 %v910_v43, %v907_v42  ;;  %v1357_v42 = vld [vmem:[%s6373_s8 + $0x58] sm:$0xff] }
 0x113   : > { %4287 = vmatpush3.bf16.msra.mxu0 %v4286_v45  ;;  %v917_v45 = vld [vmem:[%s6370_s5 + $0x170] sm:$0xff] }
 0x114   : > { %4289 = vmatprep.subr.bf16.mxu0 %v4288_v48  ;;  %v4316_v47 = vpack.c.bf16 %v917_v45, %v914_v44  ;;  %v913_v48 = vld [vmem:[%s6370_s5 + $0x150] sm:$0xff]  ;;  %v1358_v44 = vld [vmem:[%s6373_s8 + $0x60] sm:$0xff]  ;;  %v1359_v45 = vld [vmem:[%s6373_s8 + $0x68] sm:$0xff] }
 0x1c5   : > { %v610_v49 = vpop.f32.mrb[4].mxu1 }
 0x1c6   : > { %v3566_v50 = vpop.f32.mrb[5].mxu1 }
 0x1c8   : > { %v764_v51 = vpop.f32.mrb[0].mxu0 }
 0x1c9   : > { %v686_v52 = vpop.f32.mrb[6].mxu1  ;;  %v3576_v53 = vpop.f32.mrb[1].mxu0 }
 0x1ca   : > { %v687_v54 = vadd.f32 %v686_v52, %v610_v49  ;;  %v3571_v55 = vpop.f32.mrb[7].mxu1  ;;  %v916_v49 = vld [vmem:[%s6370_s5 + $0x168] sm:$0xff] }
 0x1cb   : > { %v4318_v50 = vpack.c.bf16 %v916_v49, %v913_v48  ;;  %v876_v52 = vld [vmem:[%s6370_s5 + $0x28] sm:$0xff]  ;;  %v882_v55 = vld [vmem:[%s6370_s5 + $0x58] sm:$0xff] }
 0x1cc   : > { %v768_v56 = vadd.f32 %v764_v51, %v687_v54  ;;  %v873_v51 = vld [vmem:[%s6370_s5 + $0x10] sm:$0xff]  ;;  %v879_v54 = vld [vmem:[%s6370_s5 + $0x40] sm:$0xff]  ;;  %v1361_v48 = vld [vmem:[%s6373_s8 + $0x78] sm:$0xff] }
 0x1cd   : > { %v4321_v53 = vpack.c.bf16 %v876_v52, %v873_v51  ;;  %v3051_v51 = vld [vmem:[%s6374_s9 + $0x308] sm:$0xff] }
 0x1ce   : > { %v775_v58 = vadd.f32 %v773_v57, %v768_v56 }
 0x1d0   : > { %v777_v59 = vand.u32 2147483647, %v775_v58  ;;  %v776_v6 = vmax.f32 %v775_v58, 0.0  ;;  %v4324_v58 = vpack.c.bf16 %v882_v55, %v879_v54  ;;  %v3053_v54 = vld [vmem:[%s6374_s9 + $0x318] sm:$0xff] }
 0x1d2   : > { %v778_v60 = vsub.f32 0.0, %v777_v59  ;;  %v885_v59 = vld [vmem:[%s6370_s5 + $0x70] sm:$0xff] }
 0x1d4   : > { %v779_v61 = vmul.f32 1.442695, %v778_v60  ;;  %v888_v60 = vld [vmem:[%s6370_s5 + $0x88] sm:$0xff] }
 0x1d6   : > { %4839 = vpow2.f32 %v779_v61  ;;  %v4327_v61 = vpack.c.bf16 %v888_v60, %v885_v59  ;;  %v3056_v59 = vld [vmem:[%s6374_s9 + $0x330] sm:$0xff]  ;;  %v3057_v60 = vld [vmem:[%s6374_s9 + $0x338] sm:$0xff] }
 0x1e0   : > { %v4840_v62 = vpop.eup %4839 }
 0x1e1   : > { %v781_v63 = vadd.f32 1.0, %v4840_v62  ;;  %v891_v62 = vld [vmem:[%s6370_s5 + $0xa0] sm:$0xff] }
 0x1e3   : > { %4841 = vlog2.f32 %v781_v63  ;;  %v894_v63 = vld [vmem:[%s6370_s5 + $0xb8] sm:$0xff] }
 0x1e4   : > { %v4330_v0 = vpack.c.bf16 %v894_v63, %v891_v62  ;;  %v3058_v62 = vld [vmem:[%s6374_s9 + $0x340] sm:$0xff]  ;;  %v3059_v63 = vld [vmem:[%s6374_s9 + $0x348] sm:$0xff] }
 0x1ed   : > { %v4842_v2 = vpop.eup %4841 }
 0x1ee   : > { %v783_v7 = vmul.f32 0.6931472, %v4842_v2  ;;  %v900_v2 = vld [vmem:[%s6370_s5 + $0xe8] sm:$0xff] }
 0x1ef   : > { %v4333_v3 = vpack.c.bf16 %v900_v2, %v897_v1  ;;  %v3060_v1 = vld [vmem:[%s6374_s9 + $0x350] sm:$0xff]  ;;  %v3061_v2 = vld [vmem:[%s6374_s9 + $0x358] sm:$0xff] }
 0x1f0   : > { %v784_v9 = vadd.f32 %v783_v7, %v776_v6  ;;  %v906_v6 = vld [vmem:[%s6370_s5 + $0x118] sm:$0xff] }
 0x1f1   : > { %v4336_v7 = vpack.c.bf16 %v906_v6, %v903_v4  ;;  %v3062_v4 = vld [vmem:[%s6374_s9 + $0x360] sm:$0xff]  ;;  %v3063_v6 = vld [vmem:[%s6374_s9 + $0x368] sm:$0xff] }
 0x1f2   : > { %3610 = vmatmul.mubr.f32.vlgmr.msra.gmra.mrb[2].mxu0 %v784_v9  ;;  %v912_v9 = vld [vmem:[%s6370_s5 + $0x148] sm:$0xff] }
 0x1f3   : > { %4291 = vmatpush1.bf16.msra.mxu0 %v4290_v8  ;;  %983 = vmatprep.mubr.f32.mxu0 %v4915_v5  ;;  %v909_v8 = vld [vmem:[%s6370_s5 + $0x130] sm:$0xff] }
 0x1f4   : > { %4293 = vmatprep.subr.bf16.mxu0 %v4292_v11  ;;  %v4339_v11 = vpack.c.bf16 %v912_v9, %v909_v8 }
 0x1f7   : > { %4295 = vmatpush1.bf16.msra.mxu0 %v4294_v16  ;;  %v1315_v16 = vld [vmem:[%s6372_s7 + $0x8] sm:$0xff] }
 0x1f8   : > { %4297 = vmatprep.subr.bf16.mxu0 %v4296_v17  ;;  %1323 = vperm.xlu1 %4838, %v1315_v16  }
 0x1fb   : > { %4299 = vmatpush1.bf16.msra.mxu0 %v4298_v22  ;;  %v2966_v22 = vld [vmem:[%s6371_s6 + $0x20] sm:$0xff] }
 0x1fc   : > { %4301 = vmatprep.subr.bf16.mxu0 %v4300_v23 }
 0x1ff   : > { %4303 = vmatpush1.bf16.msra.mxu0 %v4302_v28  ;;  %v4344_v28 = vpack.c.bf16 %v1347_v27, %v1346_v26 }
 0x200   : > { %4305 = vmatprep.subr.bf16.mxu0 %v4304_v29  ;;  %v1348_v29 = vld [vmem:[%s6373_s8 + $0x10] sm:$0xff] }
 0x201   : > { %v4348_v31 = vpack.c.bf16 %v1349_v30, %v1348_v29  ;;  %v1439_v29 = vld [vmem:[%s6374_s9 + $0x8] sm:$0xff] }
 0x203   : > { %4307 = vmatpush1.bf16.msra.mxu0 %v4306_v34  ;;  %v4352_v34 = vpack.c.bf16 %v1351_v33, %v1350_v32 }
 0x204   : > { %4309 = vmatprep.subr.bf16.mxu0 %v4308_v35  ;;  %v1352_v35 = vld [vmem:[%s6373_s8 + $0x30] sm:$0xff] }
 0x205   : > { %v4356_v37 = vpack.c.bf16 %v1353_v36, %v1352_v35  ;;  %v1440_v36 = vld [vmem:[%s6374_s9 + $0x10] sm:$0xff] }
 0x207   : > { %4311 = vmatpush1.bf16.msra.mxu0 %v4310_v40  ;;  %v4360_v40 = vpack.c.bf16 %v1355_v39, %v1354_v38  ;;  %v1442_v39 = vld [vmem:[%s6374_s9 + $0x20] sm:$0xff] }
 0x208   : > { %4313 = vmatprep.subr.bf16.mxu0 %v4312_v41  ;;  %v1356_v41 = vld [vmem:[%s6373_s8 + $0x50] sm:$0xff] }
 0x209   : > { %v4364_v43 = vpack.c.bf16 %v1357_v42, %v1356_v41  ;;  %v1444_v42 = vld [vmem:[%s6374_s9 + $0x30] sm:$0xff] }
 0x20b   : > { %4315 = vmatpush1.bf16.msra.mxu0 %v4314_v46  ;;  %v4368_v46 = vpack.c.bf16 %v1359_v45, %v1358_v44  ;;  %v1446_v45 = vld [vmem:[%s6374_s9 + $0x40] sm:$0xff] }
 0x20c   : > { %4317 = vmatprep.subr.bf16.mxu0 %v4316_v47  ;;  %v1360_v47 = vld [vmem:[%s6373_s8 + $0x70] sm:$0xff] }
 0x20d   : > { %v4372_v49 = vpack.c.bf16 %v1361_v48, %v1360_v47  ;;  %v1448_v48 = vld [vmem:[%s6374_s9 + $0x50] sm:$0xff] }
 0x20f   : > { %4319 = vmatpush1.bf16.msra.mxu0 %v4318_v50  ;;  %v3050_v50 = vld [vmem:[%s6374_s9 + $0x300] sm:$0xff] }
 0x210   : > { %4320 = vmatprep.subr.bf16.mxu0 %v4917_v10  ;;  %v4521_v52 = vpack.c.bf16 %v3051_v51, %v3050_v50  ;;  %v1450_v51 = vld [vmem:[%s6374_s9 + $0x60] sm:$0xff] }
 0x212   : > { %4522 = vmatpush3.bf16.msra.mxu1 %v4521_v52  ;;  %v1451_v52 = vld [vmem:[%s6374_s9 + $0x68] sm:$0xff] }
 0x213   : > { %4523 = vmatprep.subr.bf16.mxu1 %v4917_v10 }
 0x277   : > { %v1324_v8 = vpop.permute.xlu1 %1323 }
 0x2c5   : > { %v867_v56 = vpop.f32.mrb[2].mxu0 }
 0x2c6   : > { %v3611_v57 = vpop.f32.mrb[3].mxu0  ;;  %984 = vmatmul.mubr.f32.vlgmr.msra.gmra.mrb[4].mxu0 %v867_v56 }
 0x2c7   : > { %4322 = vmatpush3.bf16.msra.mxu0 %v4321_v53  ;;  %3644 = vmatprep.mubr.msk.f32.mxu0 %vm4916_vm0, %v4915_v5  ;;  %v3052_v53 = vld [vmem:[%s6374_s9 + $0x310] sm:$0xff]  ;;  %v3055_v57 = vld [vmem:[%s6374_s9 + $0x328] sm:$0xff] }
 0x2c8   : > { %4323 = vmatprep.subr.bf16.mxu0 %v4917_v10  ;;  %v4524_v55 = vpack.c.bf16 %v3053_v54, %v3052_v53  ;;  %v4395_v53 = vpack.c.bf16 %v1451_v52, %v1450_v51  ;;  %v1452_v54 = vld [vmem:[%s6374_s9 + $0x70] sm:$0xff]  ;;  %v3082_v51 = vld [vmem:[%s6374_s9 + $0x400] sm:$0xff]  ;;  %v3083_v52 = vld [vmem:[%s6374_s9 + $0x408] sm:$0xff] }
 0x2ca   : > { %4525 = vmatpush3.bf16.msra.mxu1 %v4524_v55  ;;  %v1453_v55 = vld [vmem:[%s6374_s9 + $0x78] sm:$0xff] }
 0x2cb   : > { %4325 = vmatpush3.bf16.msra.mxu0 %v4324_v58  ;;  %4526 = vmatprep.subr.bf16.mxu1 %v4917_v10 }
 0x2cc   : > { %4326 = vmatprep.subr.bf16.mxu0 %v4917_v10 }
 0x2cf   : > { %4328 = vmatpush3.bf16.msra.mxu0 %v4327_v61  ;;  %v4530_v61 = vpack.c.bf16 %v3057_v60, %v3056_v59  ;;  %v2970_v60 = vld [vmem:[%s6374_s9 + $0x80] sm:$0xff] }
 0x2d0   : > { %4329 = vmatprep.subr.bf16.mxu0 %v4917_v10 }
 0x2d3   : > { %4331 = vmatpush3.bf16.msra.mxu0 %v4330_v0  ;;  %v4533_v0 = vpack.c.bf16 %v3059_v63, %v3058_v62  ;;  %v3066_v62 = vld [vmem:[%s6374_s9 + $0x380] sm:$0xff]  ;;  %v3067_v63 = vld [vmem:[%s6374_s9 + $0x388] sm:$0xff] }
 0x2d4   : > { %4332 = vmatprep.subr.bf16.mxu0 %v4917_v10 }
 0x2d7   : > { %4334 = vmatpush3.bf16.msra.mxu0 %v4333_v3  ;;  %v4536_v3 = vpack.c.bf16 %v3061_v2, %v3060_v1  ;;  %v2972_v2 = vld [vmem:[%s6374_s9 + $0x90] sm:$0xff] }
 0x2d8   : > { %4335 = vmatprep.subr.bf16.mxu0 %v4917_v10 }
 0x2db   : > { %4337 = vmatpush3.bf16.msra.mxu0 %v4336_v7  ;;  %v4539_v7 = vpack.c.bf16 %v3063_v6, %v3062_v4  ;;  %v4545_v6 = vpack.c.bf16 %v3067_v63, %v3066_v62  ;;  %v2990_v62 = vld [vmem:[%s6374_s9 + $0x120] sm:$0xff]  ;;  %v2991_v63 = vld [vmem:[%s6374_s9 + $0x128] sm:$0xff] }
 0x2dc   : > { %4338 = vmatprep.subr.bf16.mxu0 %v4917_v10 }
 0x2df   : > { %4340 = vmatpush3.bf16.msra.mxu0 %v4339_v11  ;;  %v1319_v11 = vpop.permute.xlu0 %1318 }
 0x2e0   : > { %4341 = vmatprep.subr.bf16.mxu0 %v4917_v10 }
 0x2e3   : > { %4343 = vmatpush3.bf16.msra.mxu0 %v4342_v14 }
 0x2e6   : > { %3645 = vmatmul.mubr.f32.vlgmr.msra.gmra.mrb[6].mxu0 %v867_v56  ;;  %v3054_v56 = vld [vmem:[%s6374_s9 + $0x320] sm:$0xff] }
 0x2e7   : > { %3649 = vmatprep.mubr.msk.f32.mxu0 %vm1065_vm4, %v2960_v15  ;;  %v4527_v58 = vpack.c.bf16 %v3055_v57, %v3054_v56  ;;  %v4398_v56 = vpack.c.bf16 %v1453_v55, %v1452_v54  ;;  %v3064_v57 = vld [vmem:[%s6374_s9 + $0x370] sm:$0xff] }
 0x2e8   : > { %v2988_v55 = vld [vmem:[%s6374_s9 + $0x110] sm:$0xff] }
 0x2e9   : > { %4528 = vmatpush3.bf16.msra.mxu1 %v4527_v58  ;;  %v3065_v58 = vld [vmem:[%s6374_s9 + $0x378] sm:$0xff] }
 0x2ea   : > { %4529 = vmatprep.subr.bf16.mxu1 %v4917_v10  ;;  %v4542_v59 = vpack.c.bf16 %v3065_v58, %v3064_v57  ;;  %v4569_v57 = vpack.c.bf16 %v3083_v52, %v3082_v51  ;;  %v3006_v51 = vld [vmem:[%s6374_s9 + $0x1a0] sm:$0xff]  ;;  %v3007_v52 = vld [vmem:[%s6374_s9 + $0x1a8] sm:$0xff] }
 0x2ed   : > { %4531 = vmatpush3.bf16.msra.mxu1 %v4530_v61  ;;  %v2971_v61 = vld [vmem:[%s6374_s9 + $0x88] sm:$0xff] }
 0x2ee   : > { %4532 = vmatprep.subr.bf16.mxu1 %v4917_v10 }
 0x2f1   : > { %4534 = vmatpush3.bf16.msra.mxu1 %v4533_v0  ;;  %v4401_v0 = vpack.c.bf16 %v2971_v61, %v2970_v60  ;;  %v3085_v60 = vld [vmem:[%s6374_s9 + $0x418] sm:$0xff] }
 0x2f2   : > { %4535 = vmatprep.subr.bf16.mxu1 %v4917_v10 }
 0x2f5   : > { %4537 = vmatpush3.bf16.msra.mxu1 %v4536_v3  ;;  %v2973_v3 = vld [vmem:[%s6374_s9 + $0x98] sm:$0xff] }
 0x2f6   : > { %4538 = vmatprep.subr.bf16.mxu1 %v4917_v10 }
 0x2f9   : > { %4540 = vmatpush3.bf16.msra.mxu1 %v4539_v7 }
 0x2fa   : > { %4541 = vmatprep.subr.bf16.mxu1 %v4917_v10 }
 0x2fd   : > { %4543 = vmatpush3.bf16.msra.mxu1 %v4542_v59  ;;  %v3084_v59 = vld [vmem:[%s6374_s9 + $0x410] sm:$0xff] }
 0x2fe   : > { %4544 = vmatprep.subr.bf16.mxu1 %v4917_v10 }
 0x399   : > { %v985_v17 = vpop.f32.mrb[4].mxu0 }
 0x39a   : > { %v987_v18 = vpop.f32.mrb[5].mxu0 }
 0x39b   : > { %3647 = vmatprep.subr.mxu0 %v987_v18 }
 0x39c   : > { %3648 = vmatpush3.msra.mxu0 %v987_v18 }
 0x39d   : > { %3652 = vmatprep.subr.mxu0 %v985_v17  ;;  %3650 = vmatmul.mubr.msk.f32.vlgmr.msra.gmra.mrb[8].mxu0 %vm1065_vm4, %v2961_v19 }
 0x39e   : > { %3653 = vmatpush3.msra.mxu0 %v985_v17  ;;  %3654 = vmatprep.mubr.msk.f32.mxu0 %vm1065_vm4, %v1060_v20 }
 0x3a5   : > { %3655 = vmatmul.mubr.msk.f32.vlgmr.msra.gmra.mrb[8].mxu0 %vm1065_vm4, %v1061_v21 }
 0x3a6   : > { %3659 = vmatprep.mubr.msk.f32.mxu0 %vm1065_vm4, %v2966_v22 }
 0x3b9   : > { %v1056_v23 = vpop.f32.mrb[6].mxu0 }
 0x3ba   : > { %v3646_v25 = vpop.f32.mrb[7].mxu0  ;;  %3657 = vmatprep.subr.mxu0 %v1056_v23 }
 0x3bb   : > { %3658 = vmatpush3.msra.mxu0 %v1056_v23 }
 0x3bc   : > { %3660 = vmatmul.mubr.msk.f32.vlgmr.msra.gmra.mrb[8].mxu0 %vm1065_vm4, %v2967_v24  ;;  %4345 = vmatprep.subr.bf16.mxu0 %v4344_v28 }
 0x3bd   : > { %4347 = vmatpush3.bf16.msra.mxu0 %v4344_v28  ;;  %v1438_v28 = vld [vmem:[%s6374_s9] sm:$0xff] }
 0x3be   : > { %4349 = vmatprep.subr.bf16.mxu0 %v4348_v31 }
 0x3c1   : > { %4351 = vmatpush3.bf16.msra.mxu0 %v4348_v31 }
 0x3c2   : > { %4353 = vmatprep.subr.bf16.mxu0 %v4352_v34 }
 0x3c5   : > { %4355 = vmatpush3.bf16.msra.mxu0 %v4352_v34  ;;  %v4377_v34 = vpack.c.bf16 %v1439_v29, %v1438_v28  ;;  %v3075_v28 = vld [vmem:[%s6374_s9 + $0x3c8] sm:$0xff] }
 0x3c6   : > { %4357 = vmatprep.subr.bf16.mxu0 %v4356_v37 }
 0x3c9   : > { %4359 = vmatpush3.bf16.msra.mxu0 %v4356_v37  ;;  %v1441_v37 = vld [vmem:[%s6374_s9 + $0x18] sm:$0xff] }
 0x3ca   : > { %4361 = vmatprep.subr.bf16.mxu0 %v4360_v40  ;;  %v4380_v38 = vpack.c.bf16 %v1441_v37, %v1440_v36  ;;  %v2982_v36 = vld [vmem:[%s6374_s9 + $0xe0] sm:$0xff]  ;;  %v2983_v37 = vld [vmem:[%s6374_s9 + $0xe8] sm:$0xff] }
 0x3cd   : > { %4363 = vmatpush3.bf16.msra.mxu0 %v4360_v40  ;;  %v1443_v40 = vld [vmem:[%s6374_s9 + $0x28] sm:$0xff] }
 0x3ce   : > { %4365 = vmatprep.subr.bf16.mxu0 %v4364_v43  ;;  %v4383_v41 = vpack.c.bf16 %v1443_v40, %v1442_v39  ;;  %v3078_v39 = vld [vmem:[%s6374_s9 + $0x3e0] sm:$0xff]  ;;  %v3079_v40 = vld [vmem:[%s6374_s9 + $0x3e8] sm:$0xff] }
 0x3d1   : > { %4367 = vmatpush3.bf16.msra.mxu0 %v4364_v43  ;;  %v1445_v43 = vld [vmem:[%s6374_s9 + $0x38] sm:$0xff] }
 0x3d2   : > { %4369 = vmatprep.subr.bf16.mxu0 %v4368_v46  ;;  %v4386_v44 = vpack.c.bf16 %v1445_v43, %v1444_v42  ;;  %v2984_v42 = vld [vmem:[%s6374_s9 + $0xf0] sm:$0xff]  ;;  %v2985_v43 = vld [vmem:[%s6374_s9 + $0xf8] sm:$0xff] }
 0x3d5   : > { %4371 = vmatpush3.bf16.msra.mxu0 %v4368_v46  ;;  %v1447_v46 = vld [vmem:[%s6374_s9 + $0x48] sm:$0xff] }
 0x3d6   : > { %4373 = vmatprep.subr.bf16.mxu0 %v4372_v49  ;;  %v4389_v47 = vpack.c.bf16 %v1447_v46, %v1446_v45  ;;  %v3080_v45 = vld [vmem:[%s6374_s9 + $0x3f0] sm:$0xff]  ;;  %v3081_v46 = vld [vmem:[%s6374_s9 + $0x3f8] sm:$0xff] }
 0x3d9   : > { %4375 = vmatpush3.bf16.msra.mxu0 %v4372_v49  ;;  %v1449_v49 = vld [vmem:[%s6374_s9 + $0x58] sm:$0xff] }
 0x3da   : > { %4376 = vmatprep.subr.bf16.mxu0 %v4917_v10  ;;  %v4392_v50 = vpack.c.bf16 %v1449_v49, %v1448_v48  ;;  %v2986_v48 = vld [vmem:[%s6374_s9 + $0x100] sm:$0xff]  ;;  %v2987_v49 = vld [vmem:[%s6374_s9 + $0x108] sm:$0xff] }
 0x48f   : > { %v3661_v9 = vpop.f32.mrb[8].mxu0 }
 0x490   : > { %v1327_v12 = vadd.f32 %v3661_v9, %v1324_v8  ;;  %v1303_v13 = vpop.f32.mrb[9].mxu0  ;;  %v3068_v8 = vld [vmem:[%s6374_s9 + $0x390] sm:$0xff]  ;;  %v3069_v9 = vld [vmem:[%s6374_s9 + $0x398] sm:$0xff] }
 0x491   : > { %v1326_v14 = vadd.f32 %v1319_v11, %v1303_v13  ;;  %v4404_v11 = vpack.c.bf16 %v2973_v3, %v2972_v2  ;;  %v2975_v13 = vld [vmem:[%s6374_s9 + $0xa8] sm:$0xff]  ;;  %v3086_v2 = vld [vmem:[%s6374_s9 + $0x420] sm:$0xff] }
 0x492   : > { %v1331_v15 = vand.u32 2147483647, %v1327_v12  ;;  %v1329_v32 = vmax.f32 %v1327_v12, 0.0  ;;  %v2974_v12 = vld [vmem:[%s6374_s9 + $0xa0] sm:$0xff]  ;;  %v3087_v3 = vld [vmem:[%s6374_s9 + $0x428] sm:$0xff] }
 0x493   : > { %v1330_v16 = vand.u32 2147483647, %v1326_v14  ;;  %v1328_v30 = vmax.f32 %v1326_v14, 0.0  ;;  %v4548_v14 = vpack.c.bf16 %v3069_v9, %v3068_v8  ;;  %v2993_v8 = vld [vmem:[%s6374_s9 + $0x138] sm:$0xff]  ;;  %v4575_v9 = vpack.c.bf16 %v3087_v3, %v3086_v2  ;;  %v3106_v3 = vld [vmem:[%s6374_s9 + $0x4c0] sm:$0xff] }
 0x494   : > { %v1333_v17 = vsub.f32 0.0, %v1331_v15  ;;  %v3070_v15 = vld [vmem:[%s6374_s9 + $0x3a0] sm:$0xff] }
 0x495   : > { %v1332_v18 = vsub.f32 0.0, %v1330_v16  ;;  %v3071_v16 = vld [vmem:[%s6374_s9 + $0x3a8] sm:$0xff] }
 0x496   : > { %v1336_v19 = vmul.f32 1.442695, %v1333_v17  ;;  %v4407_v17 = vpack.c.bf16 %v2975_v13, %v2974_v12  ;;  %v3089_v12 = vld [vmem:[%s6374_s9 + $0x438] sm:$0xff] }
 0x497   : > { %v1334_v20 = vmul.f32 1.442695, %v1332_v18  ;;  %v2976_v18 = vld [vmem:[%s6374_s9 + $0xb0] sm:$0xff] }
 0x498   : > { %4843 = vpow2.f32 %v1336_v19  ;;  %v2977_v19 = vld [vmem:[%s6374_s9 + $0xb8] sm:$0xff] }
 0x499   : > { %4845 = vpow2.f32 %v1334_v20  ;;  %v4551_v20 = vpack.c.bf16 %v3071_v16, %v3070_v15  ;;  %v2995_v15 = vld [vmem:[%s6374_s9 + $0x148] sm:$0xff] }
 0x4a2   : > { %v4844_v21 = vpop.eup %4843 }
 0x4a3   : > { %v4846_v22 = vpop.eup %4845  ;;  %v1339_v23 = vadd.f32 1.0, %v4844_v21  ;;  %v3072_v21 = vld [vmem:[%s6374_s9 + $0x3b0] sm:$0xff] }
 0x4a4   : > { %v1338_v24 = vadd.f32 1.0, %v4846_v22  ;;  %v3073_v22 = vld [vmem:[%s6374_s9 + $0x3b8] sm:$0xff] }
 0x4a5   : > { %4847 = vlog2.f32 %v1339_v23  ;;  %v4410_v23 = vpack.c.bf16 %v2977_v19, %v2976_v18  ;;  %v3091_v18 = vld [vmem:[%s6374_s9 + $0x448] sm:$0xff] }
 0x4a6   : > { %4849 = vlog2.f32 %v1338_v24  ;;  %v2978_v24 = vld [vmem:[%s6374_s9 + $0xc0] sm:$0xff] }
 0x4af   : > { %v4848_v25 = vpop.eup %4847 }
 0x4b0   : > { %v4850_v26 = vpop.eup %4849  ;;  %v1343_v27 = vmul.f32 0.6931472, %v4848_v25  ;;  %v2979_v25 = vld [vmem:[%s6374_s9 + $0xc8] sm:$0xff] }
 0x4b1   : > { %v1341_v31 = vmul.f32 0.6931472, %v4850_v26  ;;  %v4554_v26 = vpack.c.bf16 %v3073_v22, %v3072_v21  ;;  %v4413_v29 = vpack.c.bf16 %v2979_v25, %v2978_v24  ;;  %v2997_v21 = vld [vmem:[%s6374_s9 + $0x158] sm:$0xff] }
 0x4b2   : > { %v1345_v35 = vadd.f32 %v1343_v27, %v1329_v32  ;;  %v3074_v27 = vld [vmem:[%s6374_s9 + $0x3c0] sm:$0xff]  ;;  %v3093_v24 = vld [vmem:[%s6374_s9 + $0x458] sm:$0xff] }
 0x4b3   : > { %v1344_v33 = vadd.f32 %v1341_v31, %v1328_v30  ;;  %v2980_v30 = vld [vmem:[%s6374_s9 + $0xd0] sm:$0xff]  ;;  %v2981_v31 = vld [vmem:[%s6374_s9 + $0xd8] sm:$0xff]  ;;  %v4557_v32 = vpack.c.bf16 %v3075_v28, %v3074_v27  ;;  %v2999_v27 = vld [vmem:[%s6374_s9 + $0x168] sm:$0xff] }
 0x4b5   : > { %3694 = vmatprep.mubr.f32.mxu0 %v1344_v33  ;;  %v3076_v33 = vld [vmem:[%s6374_s9 + $0x3d0] sm:$0xff] }
 0x4b6   : > { %3695 = vmatmul.mubr.f32.vlgmr.msra.gmra.mrb[10].mxu0 %v1345_v35  ;;  %v4416_v35 = vpack.c.bf16 %v2981_v31, %v2980_v30  ;;  %v3095_v30 = vld [vmem:[%s6374_s9 + $0x468] sm:$0xff] }
 0x4b7   : > { %4378 = vmatpush3.bf16.msra.mxu0 %v4377_v34  ;;  %3729 = vmatprep.mubr.msk.f32.mxu0 %vm4916_vm0, %v4915_v5  ;;  %v3077_v34 = vld [vmem:[%s6374_s9 + $0x3d8] sm:$0xff] }
 0x4b8   : > { %4379 = vmatprep.subr.bf16.mxu0 %v4917_v10 }
 0x4bb   : > { %4381 = vmatpush3.bf16.msra.mxu0 %v4380_v38  ;;  %v4560_v38 = vpack.c.bf16 %v3077_v34, %v3076_v33  ;;  %v3001_v33 = vld [vmem:[%s6374_s9 + $0x178] sm:$0xff] }
 0x4bc   : > { %4382 = vmatprep.subr.bf16.mxu0 %v4917_v10 }
 0x4bf   : > { %4384 = vmatpush3.bf16.msra.mxu0 %v4383_v41  ;;  %v4419_v41 = vpack.c.bf16 %v2983_v37, %v2982_v36  ;;  %v3097_v36 = vld [vmem:[%s6374_s9 + $0x478] sm:$0xff] }
 0x4c0   : > { %4385 = vmatprep.subr.bf16.mxu0 %v4917_v10 }
 0x4c3   : > { %4387 = vmatpush3.bf16.msra.mxu0 %v4386_v44  ;;  %v4563_v44 = vpack.c.bf16 %v3079_v40, %v3078_v39  ;;  %v3003_v39 = vld [vmem:[%s6374_s9 + $0x188] sm:$0xff] }
 0x4c4   : > { %4388 = vmatprep.subr.bf16.mxu0 %v4917_v10 }
 0x4c7   : > { %4390 = vmatpush3.bf16.msra.mxu0 %v4389_v47  ;;  %v4422_v47 = vpack.c.bf16 %v2985_v43, %v2984_v42  ;;  %v3099_v42 = vld [vmem:[%s6374_s9 + $0x488] sm:$0xff] }
 0x4c8   : > { %4391 = vmatprep.subr.bf16.mxu0 %v4917_v10 }
 0x4cb   : > { %4393 = vmatpush3.bf16.msra.mxu0 %v4392_v50  ;;  %v4566_v50 = vpack.c.bf16 %v3081_v46, %v3080_v45  ;;  %v3004_v45 = vld [vmem:[%s6374_s9 + $0x190] sm:$0xff]  ;;  %v3005_v46 = vld [vmem:[%s6374_s9 + $0x198] sm:$0xff] }
 0x4cc   : > { %4394 = vmatprep.subr.bf16.mxu0 %v4917_v10 }
 0x4cf   : > { %4396 = vmatpush3.bf16.msra.mxu0 %v4395_v53  ;;  %v4425_v53 = vpack.c.bf16 %v2987_v49, %v2986_v48  ;;  %v3100_v48 = vld [vmem:[%s6374_s9 + $0x490] sm:$0xff]  ;;  %v3101_v49 = vld [vmem:[%s6374_s9 + $0x498] sm:$0xff] }
 0x4d0   : > { %4397 = vmatprep.subr.bf16.mxu0 %v4917_v10 }
 0x4d3   : > { %4399 = vmatpush3.bf16.msra.mxu0 %v4398_v56  ;;  %v2989_v56 = vld [vmem:[%s6374_s9 + $0x118] sm:$0xff] }
 0x4d4   : > { %4400 = vmatprep.subr.bf16.mxu0 %v4917_v10  ;;  %v4428_v61 = vpack.c.bf16 %v2989_v56, %v2988_v55  ;;  %v3103_v55 = vld [vmem:[%s6374_s9 + $0x4a8] sm:$0xff]  ;;  %v4455_v56 = vpack.c.bf16 %v3007_v52, %v3006_v51  ;;  %v3121_v51 = vld [vmem:[%s6374_s9 + $0x538] sm:$0xff] }
 0x589   : > { %v5497_v1 = vpop.f32.mrb[10].mxu0 }
 0x58a   : > { %v5505_v4 = vpop.f32.mrb[11].mxu0 }
 0x58b   : > { %3730 = vmatmul.mubr.f32.vlgmr.msra.gmra.mrb[12].mxu0 %v5505_v4  ;;  %v1993_v7 = vrot.slane %v5505_v4, 6  ;;  %v1543_v54 = vrot.slane %v5505_v4, 1  ;;  %v2083_v58 = vrot.slane %v5505_v4, 7 }
 0x58c   : > { %4402 = vmatpush3.bf16.msra.mxu0 %v4401_v0  ;;  %3764 = vmatprep.mubr.msk.f32.mxu0 %vm4916_vm0, %v4915_v5  ;;  %v4572_v0 = vpack.c.bf16 %v3085_v60, %v3084_v59  ;;  %v3104_v60 = vld [vmem:[%s6374_s9 + $0x4b0] sm:$0xff] }
 0x58d   : > { %3940 = vmatmul.mubr.f32.vlgmr.msra.gmra.mrb[8].mxu1 %v1993_v7  ;;  %4403 = vmatprep.subr.bf16.mxu0 %v4917_v10  ;;  %v2992_v7 = vld [vmem:[%s6374_s9 + $0x130] sm:$0xff] }
 0x58e   : > { %4546 = vmatpush3.bf16.msra.mxu1 %v4545_v6  ;;  %3974 = vmatprep.mubr.msk.f32.mxu1 %vm4916_vm0, %v4915_v5  ;;  %v4431_v6 = vpack.c.bf16 %v2991_v63, %v2990_v62  ;;  %v4434_v13 = vpack.c.bf16 %v2993_v8, %v2992_v7  ;;  %v3010_v63 = vld [vmem:[%s6374_s9 + $0x1c0] sm:$0xff]  ;;  %v3012_v8 = vld [vmem:[%s6374_s9 + $0x1d0] sm:$0xff] }
 0x58f   : > { %4547 = vmatprep.subr.bf16.mxu1 %v4917_v10 }
 0x590   : > { %4405 = vmatpush3.bf16.msra.mxu0 %v4404_v11  ;;  %v3088_v11 = vld [vmem:[%s6374_s9 + $0x430] sm:$0xff] }
 0x591   : > { %4406 = vmatprep.subr.bf16.mxu0 %v4917_v10  ;;  %v4578_v16 = vpack.c.bf16 %v3089_v12, %v3088_v11  ;;  %v3108_v12 = vld [vmem:[%s6374_s9 + $0x4d0] sm:$0xff] }
 0x592   : > { %4549 = vmatpush3.bf16.msra.mxu1 %v4548_v14  ;;  %v2994_v14 = vld [vmem:[%s6374_s9 + $0x140] sm:$0xff] }
 0x593   : > { %4550 = vmatprep.subr.bf16.mxu1 %v4917_v10  ;;  %v4437_v19 = vpack.c.bf16 %v2995_v15, %v2994_v14  ;;  %v3014_v15 = vld [vmem:[%s6374_s9 + $0x1e0] sm:$0xff] }
 0x594   : > { %4408 = vmatpush3.bf16.msra.mxu0 %v4407_v17  ;;  %v3090_v17 = vld [vmem:[%s6374_s9 + $0x440] sm:$0xff] }
 0x595   : > { %4409 = vmatprep.subr.bf16.mxu0 %v4917_v10  ;;  %v4581_v22 = vpack.c.bf16 %v3091_v18, %v3090_v17  ;;  %v3110_v18 = vld [vmem:[%s6374_s9 + $0x4e0] sm:$0xff] }
 0x596   : > { %4552 = vmatpush3.bf16.msra.mxu1 %v4551_v20  ;;  %v2996_v20 = vld [vmem:[%s6374_s9 + $0x150] sm:$0xff] }
 0x597   : > { %4553 = vmatprep.subr.bf16.mxu1 %v4917_v10  ;;  %v4440_v25 = vpack.c.bf16 %v2997_v21, %v2996_v20  ;;  %v3016_v21 = vld [vmem:[%s6374_s9 + $0x1f0] sm:$0xff] }
 0x598   : > { %4411 = vmatpush3.bf16.msra.mxu0 %v4410_v23  ;;  %v3092_v23 = vld [vmem:[%s6374_s9 + $0x450] sm:$0xff] }
 0x599   : > { %4412 = vmatprep.subr.bf16.mxu0 %v4917_v10  ;;  %v4584_v28 = vpack.c.bf16 %v3093_v24, %v3092_v23  ;;  %v3112_v24 = vld [vmem:[%s6374_s9 + $0x4f0] sm:$0xff] }
 0x59a   : > { %4555 = vmatpush3.bf16.msra.mxu1 %v4554_v26  ;;  %v2998_v26 = vld [vmem:[%s6374_s9 + $0x160] sm:$0xff] }
 0x59b   : > { %4556 = vmatprep.subr.bf16.mxu1 %v4917_v10  ;;  %v4443_v31 = vpack.c.bf16 %v2999_v27, %v2998_v26  ;;  %v3018_v27 = vld [vmem:[%s6374_s9 + $0x200] sm:$0xff] }
 0x59c   : > { %4414 = vmatpush3.bf16.msra.mxu0 %v4413_v29  ;;  %v3094_v29 = vld [vmem:[%s6374_s9 + $0x460] sm:$0xff] }
 0x59d   : > { %4415 = vmatprep.subr.bf16.mxu0 %v4917_v10  ;;  %v4587_v34 = vpack.c.bf16 %v3095_v30, %v3094_v29  ;;  %v3114_v30 = vld [vmem:[%s6374_s9 + $0x500] sm:$0xff] }
 0x59e   : > { %4558 = vmatpush3.bf16.msra.mxu1 %v4557_v32  ;;  %v3000_v32 = vld [vmem:[%s6374_s9 + $0x170] sm:$0xff] }
 0x59f   : > { %4559 = vmatprep.subr.bf16.mxu1 %v4917_v10  ;;  %v4446_v37 = vpack.c.bf16 %v3001_v33, %v3000_v32  ;;  %v1723_v33 = vrot.slane %v5505_v4, 3 }
 0x5a0   : > { %4417 = vmatpush3.bf16.msra.mxu0 %v4416_v35  ;;  %v3096_v35 = vld [vmem:[%s6374_s9 + $0x470] sm:$0xff] }
 0x5a1   : > { %4418 = vmatprep.subr.bf16.mxu0 %v4917_v10  ;;  %v4590_v40 = vpack.c.bf16 %v3097_v36, %v3096_v35  ;;  %v3021_v35 = vld [vmem:[%s6374_s9 + $0x218] sm:$0xff] }
 0x5a2   : > { %4561 = vmatpush3.bf16.msra.mxu1 %v4560_v38  ;;  %v3002_v38 = vld [vmem:[%s6374_s9 + $0x180] sm:$0xff] }
 0x5a3   : > { %4562 = vmatprep.subr.bf16.mxu1 %v4917_v10  ;;  %v4449_v43 = vpack.c.bf16 %v3003_v39, %v3002_v38  ;;  %v3116_v38 = vld [vmem:[%s6374_s9 + $0x510] sm:$0xff]  ;;  %v3117_v39 = vld [vmem:[%s6374_s9 + $0x518] sm:$0xff] }
 0x5a4   : > { %4420 = vmatpush3.bf16.msra.mxu0 %v4419_v41  ;;  %v3098_v41 = vld [vmem:[%s6374_s9 + $0x480] sm:$0xff] }
 0x5a5   : > { %4421 = vmatprep.subr.bf16.mxu0 %v4917_v10 }
 0x5a6   : > { %4564 = vmatpush3.bf16.msra.mxu1 %v4563_v44  ;;  %v1633_v44 = vrot.slane %v5505_v4, 2 }
 0x5a7   : > { %4565 = vmatprep.subr.bf16.mxu1 %v4917_v10 }
 0x5a8   : > { %4423 = vmatpush3.bf16.msra.mxu0 %v4422_v47  ;;  %v4593_v47 = vpack.c.bf16 %v3099_v42, %v3098_v41  ;;  %v3022_v41 = vld [vmem:[%s6374_s9 + $0x220] sm:$0xff]  ;;  %v3023_v42 = vld [vmem:[%s6374_s9 + $0x228] sm:$0xff] }
 0x5a9   : > { %4424 = vmatprep.subr.bf16.mxu0 %v4917_v10 }
 0x5aa   : > { %4567 = vmatpush3.bf16.msra.mxu1 %v4566_v50  ;;  %v4452_v50 = vpack.c.bf16 %v3005_v46, %v3004_v45  ;;  %v3119_v45 = vld [vmem:[%s6374_s9 + $0x528] sm:$0xff]  ;;  %v4479_v46 = vpack.c.bf16 %v3023_v42, %v3022_v41  ;;  %v3137_v41 = vld [vmem:[%s6374_s9 + $0x5b8] sm:$0xff] }
 0x5ab   : > { %3765 = vmatmul.mubr.f32.vlgmr.msra.gmra.mrb[12].mxu0 %v1543_v54  ;;  %4568 = vmatprep.subr.bf16.mxu1 %v4917_v10  ;;  %v3102_v54 = vld [vmem:[%s6374_s9 + $0x4a0] sm:$0xff] }
 0x5ac   : > { %4426 = vmatpush3.bf16.msra.mxu0 %v4425_v53  ;;  %3799 = vmatprep.mubr.msk.f32.mxu0 %vm4916_vm0, %v4915_v5  ;;  %v4596_v53 = vpack.c.bf16 %v3101_v49, %v3100_v48  ;;  %v4599_v59 = vpack.c.bf16 %v3103_v55, %v3102_v54  ;;  %v3025_v48 = vld [vmem:[%s6374_s9 + $0x238] sm:$0xff]  ;;  %v3027_v54 = vld [vmem:[%s6374_s9 + $0x248] sm:$0xff] }
 0x5ad   : > { %3975 = vmatmul.mubr.f32.vlgmr.msra.gmra.mrb[8].mxu1 %v2083_v58  ;;  %4427 = vmatprep.subr.bf16.mxu0 %v4917_v10  ;;  %v3009_v58 = vld [vmem:[%s6374_s9 + $0x1b8] sm:$0xff] }
 0x5ae   : > { %4570 = vmatpush3.bf16.msra.mxu1 %v4569_v57  ;;  %4009 = vmatprep.mubr.msk.f32.mxu1 %vm4916_vm0, %v4915_v5  ;;  %v3008_v57 = vld [vmem:[%s6374_s9 + $0x1b0] sm:$0xff] }
 0x5af   : > { %4571 = vmatprep.subr.bf16.mxu1 %v4917_v10  ;;  %v4458_v62 = vpack.c.bf16 %v3009_v58, %v3008_v57  ;;  %v3123_v57 = vld [vmem:[%s6374_s9 + $0x548] sm:$0xff] }
 0x5b0   : > { %4429 = vmatpush3.bf16.msra.mxu0 %v4428_v61  ;;  %v3105_v61 = vld [vmem:[%s6374_s9 + $0x4b8] sm:$0xff] }
 0x5b1   : > { %4430 = vmatprep.subr.bf16.mxu0 %v4917_v10  ;;  %v4602_v2 = vpack.c.bf16 %v3105_v61, %v3104_v60  ;;  %v3029_v60 = vld [vmem:[%s6374_s9 + $0x258] sm:$0xff] }
 0x5b2   : > { %4573 = vmatpush3.bf16.msra.mxu1 %v4572_v0  ;;  %v3011_v0 = vld [vmem:[%s6374_s9 + $0x1c8] sm:$0xff] }
 0x5b3   : > { %4574 = vmatprep.subr.bf16.mxu1 %v4917_v10  ;;  %v4461_v7 = vpack.c.bf16 %v3011_v0, %v3010_v63  ;;  %v3125_v63 = vld [vmem:[%s6374_s9 + $0x558] sm:$0xff] }
 0x5b4   : > { %4432 = vmatpush3.bf16.msra.mxu0 %v4431_v6  ;;  %v3107_v6 = vld [vmem:[%s6374_s9 + $0x4c8] sm:$0xff] }
 0x5b5   : > { %4433 = vmatprep.subr.bf16.mxu0 %v4917_v10  ;;  %v4605_v11 = vpack.c.bf16 %v3107_v6, %v3106_v3  ;;  %v3031_v3 = vld [vmem:[%s6374_s9 + $0x268] sm:$0xff] }
 0x5b6   : > { %4576 = vmatpush3.bf16.msra.mxu1 %v4575_v9  ;;  %v3013_v9 = vld [vmem:[%s6374_s9 + $0x1d8] sm:$0xff] }
 0x5b7   : > { %4577 = vmatprep.subr.bf16.mxu1 %v4917_v10  ;;  %v4464_v14 = vpack.c.bf16 %v3013_v9, %v3012_v8  ;;  %v3127_v8 = vld [vmem:[%s6374_s9 + $0x568] sm:$0xff] }
 0x5b8   : > { %4435 = vmatpush3.bf16.msra.mxu0 %v4434_v13  ;;  %v3109_v13 = vld [vmem:[%s6374_s9 + $0x4d8] sm:$0xff] }
 0x5b9   : > { %4436 = vmatprep.subr.bf16.mxu0 %v4917_v10  ;;  %v4608_v17 = vpack.c.bf16 %v3109_v13, %v3108_v12  ;;  %v3033_v12 = vld [vmem:[%s6374_s9 + $0x278] sm:$0xff] }
 0x5ba   : > { %4579 = vmatpush3.bf16.msra.mxu1 %v4578_v16  ;;  %v3015_v16 = vld [vmem:[%s6374_s9 + $0x1e8] sm:$0xff] }
 0x5bb   : > { %4580 = vmatprep.subr.bf16.mxu1 %v4917_v10  ;;  %v4467_v20 = vpack.c.bf16 %v3015_v16, %v3014_v15  ;;  %v3129_v15 = vld [vmem:[%s6374_s9 + $0x578] sm:$0xff] }
 0x5bc   : > { %4438 = vmatpush3.bf16.msra.mxu0 %v4437_v19  ;;  %v3111_v19 = vld [vmem:[%s6374_s9 + $0x4e8] sm:$0xff] }
 0x5bd   : > { %4439 = vmatprep.subr.bf16.mxu0 %v4917_v10  ;;  %v4611_v23 = vpack.c.bf16 %v3111_v19, %v3110_v18  ;;  %v3035_v18 = vld [vmem:[%s6374_s9 + $0x288] sm:$0xff] }
 0x5be   : > { %4582 = vmatpush3.bf16.msra.mxu1 %v4581_v22  ;;  %v3017_v22 = vld [vmem:[%s6374_s9 + $0x1f8] sm:$0xff] }
 0x5bf   : > { %4583 = vmatprep.subr.bf16.mxu1 %v4917_v10  ;;  %v4470_v26 = vpack.c.bf16 %v3017_v22, %v3016_v21  ;;  %v3131_v21 = vld [vmem:[%s6374_s9 + $0x588] sm:$0xff] }
 0x5c0   : > { %4441 = vmatpush3.bf16.msra.mxu0 %v4440_v25  ;;  %v3113_v25 = vld [vmem:[%s6374_s9 + $0x4f8] sm:$0xff] }
 0x5c1   : > { %4442 = vmatprep.subr.bf16.mxu0 %v4917_v10  ;;  %v4614_v29 = vpack.c.bf16 %v3113_v25, %v3112_v24  ;;  %v3036_v24 = vld [vmem:[%s6374_s9 + $0x290] sm:$0xff]  ;;  %v3037_v25 = vld [vmem:[%s6374_s9 + $0x298] sm:$0xff] }
 0x5c2   : > { %4585 = vmatpush3.bf16.msra.mxu1 %v4584_v28  ;;  %v3019_v28 = vld [vmem:[%s6374_s9 + $0x208] sm:$0xff] }
 0x5c3   : > { %4586 = vmatprep.subr.bf16.mxu1 %v4917_v10  ;;  %v4473_v32 = vpack.c.bf16 %v3019_v28, %v3018_v27  ;;  %v2352_v27 = vrot.slane %v5497_v1, 2  ;;  %v3132_v28 = vld [vmem:[%s6374_s9 + $0x590] sm:$0xff] }
 0x5c4   : > { %4444 = vmatpush3.bf16.msra.mxu0 %v4443_v31  ;;  %v3115_v31 = vld [vmem:[%s6374_s9 + $0x508] sm:$0xff] }
 0x5c5   : > { %4445 = vmatprep.subr.bf16.mxu0 %v4917_v10  ;;  %v4617_v36 = vpack.c.bf16 %v3115_v31, %v3114_v30  ;;  %v4500_v30 = vpack.c.bf16 %v3037_v25, %v3036_v24  ;;  %v3038_v31 = vld [vmem:[%s6374_s9 + $0x2a0] sm:$0xff]  ;;  %v3156_v24 = vld [vmem:[%s6374_s9 + $0x650] sm:$0xff]  ;;  %v3157_v25 = vld [vmem:[%s6374_s9 + $0x658] sm:$0xff] }
 0x5c6   : > { %4588 = vmatpush3.bf16.msra.mxu1 %v4587_v34  ;;  %v3020_v34 = vld [vmem:[%s6374_s9 + $0x210] sm:$0xff] }
 0x5c7   : > { %4589 = vmatprep.subr.bf16.mxu1 %v4917_v10 }
 0x5c8   : > { %4447 = vmatpush3.bf16.msra.mxu0 %v4446_v37  ;;  %v2262_v37 = vrot.slane %v5497_v1, 1 }
 0x5c9   : > { %4448 = vmatprep.subr.bf16.mxu0 %v4917_v10 }
 0x5ca   : > { %4591 = vmatpush3.bf16.msra.mxu1 %v4590_v40  ;;  %v4476_v40 = vpack.c.bf16 %v3021_v35, %v3020_v34  ;;  %v3134_v34 = vld [vmem:[%s6374_s9 + $0x5a0] sm:$0xff]  ;;  %v3135_v35 = vld [vmem:[%s6374_s9 + $0x5a8] sm:$0xff] }
 0x5cb   : > { %3800 = vmatmul.mubr.f32.vlgmr.msra.gmra.mrb[12].mxu0 %v1633_v44  ;;  %4592 = vmatprep.subr.bf16.mxu1 %v4917_v10  ;;  %v3118_v44 = vld [vmem:[%s6374_s9 + $0x520] sm:$0xff] }
 0x5cc   : > { %4450 = vmatpush3.bf16.msra.mxu0 %v4449_v43  ;;  %3834 = vmatprep.mubr.msk.f32.mxu0 %vm4916_vm0, %v4915_v5  ;;  %v4620_v43 = vpack.c.bf16 %v3117_v39, %v3116_v38  ;;  %v4623_v49 = vpack.c.bf16 %v3119_v45, %v3118_v44  ;;  %v3041_v38 = vld [vmem:[%s6374_s9 + $0x2b8] sm:$0xff]  ;;  %v4647_v39 = vpack.c.bf16 %v3135_v35, %v3134_v34  ;;  %v3043_v44 = vld [vmem:[%s6374_s9 + $0x2c8] sm:$0xff] }
 0x5cd   : > { %4010 = vmatmul.mubr.f32.vlgmr.msra.gmra.mrb[8].mxu1 %v5497_v1  ;;  %4451 = vmatprep.subr.bf16.mxu0 %v4917_v10  ;;  %v3163_v34 = vld [vmem:[%s6374_s9 + $0x688] sm:$0xff] }
 0x5ce   : > { %4594 = vmatpush3.bf16.msra.mxu1 %v4593_v47  ;;  %4044 = vmatprep.mubr.msk.f32.mxu1 %vm4916_vm0, %v4915_v5  ;;  %v3024_v47 = vld [vmem:[%s6374_s9 + $0x230] sm:$0xff] }
 0x5cf   : > { %4595 = vmatprep.subr.bf16.mxu1 %v4917_v10  ;;  %v4482_v52 = vpack.c.bf16 %v3025_v48, %v3024_v47  ;;  %v3139_v47 = vld [vmem:[%s6374_s9 + $0x5c8] sm:$0xff] }
 0x5d0   : > { %4453 = vmatpush3.bf16.msra.mxu0 %v4452_v50  ;;  %v3120_v50 = vld [vmem:[%s6374_s9 + $0x530] sm:$0xff] }
 0x5d1   : > { %4454 = vmatprep.subr.bf16.mxu0 %v4917_v10  ;;  %v4626_v55 = vpack.c.bf16 %v3121_v51, %v3120_v50  ;;  %v3045_v50 = vld [vmem:[%s6374_s9 + $0x2d8] sm:$0xff] }
 0x5d2   : > { %4597 = vmatpush3.bf16.msra.mxu1 %v4596_v53  ;;  %v3026_v53 = vld [vmem:[%s6374_s9 + $0x240] sm:$0xff] }
 0x5d3   : > { %4598 = vmatprep.subr.bf16.mxu1 %v4917_v10  ;;  %v4485_v58 = vpack.c.bf16 %v3027_v54, %v3026_v53  ;;  %v3141_v53 = vld [vmem:[%s6374_s9 + $0x5d8] sm:$0xff] }
 0x5d4   : > { %4456 = vmatpush3.bf16.msra.mxu0 %v4455_v56  ;;  %v3122_v56 = vld [vmem:[%s6374_s9 + $0x540] sm:$0xff] }
 0x5d5   : > { %4457 = vmatprep.subr.bf16.mxu0 %v4917_v10  ;;  %v4629_v61 = vpack.c.bf16 %v3123_v57, %v3122_v56  ;;  %v3047_v56 = vld [vmem:[%s6374_s9 + $0x2e8] sm:$0xff] }
 0x5d6   : > { %4600 = vmatpush3.bf16.msra.mxu1 %v4599_v59  ;;  %v3028_v59 = vld [vmem:[%s6374_s9 + $0x250] sm:$0xff] }
 0x5d7   : > { %4601 = vmatprep.subr.bf16.mxu1 %v4917_v10  ;;  %v4488_v0 = vpack.c.bf16 %v3029_v60, %v3028_v59  ;;  %v3143_v59 = vld [vmem:[%s6374_s9 + $0x5e8] sm:$0xff] }
 0x5d8   : > { %4459 = vmatpush3.bf16.msra.mxu0 %v4458_v62  ;;  %v3124_v62 = vld [vmem:[%s6374_s9 + $0x550] sm:$0xff] }
 0x5d9   : > { %4460 = vmatprep.subr.bf16.mxu0 %v4917_v10  ;;  %v4632_v6 = vpack.c.bf16 %v3125_v63, %v3124_v62  ;;  %v3049_v62 = vld [vmem:[%s6374_s9 + $0x2f8] sm:$0xff] }
 0x5da   : > { %4603 = vmatpush3.bf16.msra.mxu1 %v4602_v2  ;;  %v3030_v2 = vld [vmem:[%s6374_s9 + $0x260] sm:$0xff] }
 0x5db   : > { %4604 = vmatprep.subr.bf16.mxu1 %v4917_v10  ;;  %v4491_v9 = vpack.c.bf16 %v3031_v3, %v3030_v2  ;;  %v3145_v2 = vld [vmem:[%s6374_s9 + $0x5f8] sm:$0xff] }
 0x5dc   : > { %4462 = vmatpush3.bf16.msra.mxu0 %v4461_v7  ;;  %v3126_v7 = vld [vmem:[%s6374_s9 + $0x560] sm:$0xff] }
 0x5dd   : > { %4463 = vmatprep.subr.bf16.mxu0 %v4917_v10  ;;  %v4635_v13 = vpack.c.bf16 %v3127_v8, %v3126_v7  ;;  %v3146_v7 = vld [vmem:[%s6374_s9 + $0x600] sm:$0xff]  ;;  %v3147_v8 = vld [vmem:[%s6374_s9 + $0x608] sm:$0xff] }
 0x5de   : > { %4606 = vmatpush3.bf16.msra.mxu1 %v4605_v11  ;;  %v3032_v11 = vld [vmem:[%s6374_s9 + $0x270] sm:$0xff] }
 0x5df   : > { %4607 = vmatprep.subr.bf16.mxu1 %v4917_v10  ;;  %v4494_v16 = vpack.c.bf16 %v3033_v12, %v3032_v11  ;;  %v4665_v11 = vpack.c.bf16 %v3147_v8, %v3146_v7  ;;  %v2442_v12 = vrot.slane %v5497_v1, 3  ;;  %v3184_v7 = vld [vmem:[%s6374_s9 + $0x730] sm:$0xff]  ;;  %v3185_v8 = vld [vmem:[%s6374_s9 + $0x738] sm:$0xff] }
 0x5e0   : > { %4465 = vmatpush3.bf16.msra.mxu0 %v4464_v14  ;;  %v3128_v14 = vld [vmem:[%s6374_s9 + $0x570] sm:$0xff] }
 0x5e1   : > { %4466 = vmatprep.subr.bf16.mxu0 %v4917_v10  ;;  %v4638_v19 = vpack.c.bf16 %v3129_v15, %v3128_v14  ;;  %v3149_v14 = vld [vmem:[%s6374_s9 + $0x618] sm:$0xff] }
 0x5e2   : > { %4609 = vmatpush3.bf16.msra.mxu1 %v4608_v17  ;;  %v3034_v17 = vld [vmem:[%s6374_s9 + $0x280] sm:$0xff] }
 0x5e3   : > { %4610 = vmatprep.subr.bf16.mxu1 %v4917_v10  ;;  %v4497_v22 = vpack.c.bf16 %v3035_v18, %v3034_v17  ;;  %v3152_v18 = vld [vmem:[%s6374_s9 + $0x630] sm:$0xff] }
 0x5e4   : > { %4468 = vmatpush3.bf16.msra.mxu0 %v4467_v20  ;;  %v3130_v20 = vld [vmem:[%s6374_s9 + $0x580] sm:$0xff] }
 0x5e5   : > { %4469 = vmatprep.subr.bf16.mxu0 %v4917_v10 }
 0x5e6   : > { %4612 = vmatpush3.bf16.msra.mxu1 %v4611_v23  ;;  %v1813_v23 = vrot.slane %v5505_v4, 4 }
 0x5e7   : > { %4613 = vmatprep.subr.bf16.mxu1 %v4917_v10 }
 0x5e8   : > { %4471 = vmatpush3.bf16.msra.mxu0 %v4470_v26  ;;  %v4641_v26 = vpack.c.bf16 %v3131_v21, %v3130_v20  ;;  %v3154_v21 = vld [vmem:[%s6374_s9 + $0x640] sm:$0xff] }
 0x5e9   : > { %4472 = vmatprep.subr.bf16.mxu0 %v4917_v10 }
 0x5ea   : > { %4615 = vmatpush3.bf16.msra.mxu1 %v4614_v29  ;;  %v3133_v29 = vld [vmem:[%s6374_s9 + $0x598] sm:$0xff] }
 0x5eb   : > { %3835 = vmatmul.mubr.f32.vlgmr.msra.gmra.mrb[12].mxu0 %v1723_v33  ;;  %4616 = vmatprep.subr.bf16.mxu1 %v4917_v10  ;;  %v4644_v33 = vpack.c.bf16 %v3133_v29, %v3132_v28  ;;  %v3159_v28 = vld [vmem:[%s6374_s9 + $0x668] sm:$0xff] }
 0x5ec   : > { %4474 = vmatpush3.bf16.msra.mxu0 %v4473_v32  ;;  %3869 = vmatprep.mubr.msk.f32.mxu0 %vm4916_vm0, %v4915_v5  ;;  %v3039_v32 = vld [vmem:[%s6374_s9 + $0x2a8] sm:$0xff] }
 0x5ed   : > { %4045 = vmatmul.mubr.f32.vlgmr.msra.gmra.mrb[8].mxu1 %v2262_v37  ;;  %4475 = vmatprep.subr.bf16.mxu0 %v4917_v10  ;;  %v3040_v37 = vld [vmem:[%s6374_s9 + $0x2b0] sm:$0xff] }
 0x5ee   : > { %4618 = vmatpush3.bf16.msra.mxu1 %v4617_v36  ;;  %4079 = vmatprep.mubr.msk.f32.mxu1 %vm4916_vm0, %v4915_v5  ;;  %v4503_v36 = vpack.c.bf16 %v3039_v32, %v3038_v31  ;;  %v4506_v42 = vpack.c.bf16 %v3041_v38, %v3040_v37  ;;  %v3161_v31 = vld [vmem:[%s6374_s9 + $0x678] sm:$0xff]  ;;  %v3164_v37 = vld [vmem:[%s6374_s9 + $0x690] sm:$0xff] }
 0x5ef   : > { %4619 = vmatprep.subr.bf16.mxu1 %v4917_v10  ;;  %v3165_v38 = vld [vmem:[%s6374_s9 + $0x698] sm:$0xff] }
 0x5f0   : > { %4477 = vmatpush3.bf16.msra.mxu0 %v4476_v40  ;;  %v3136_v40 = vld [vmem:[%s6374_s9 + $0x5b0] sm:$0xff] }
 0x5f1   : > { %4478 = vmatprep.subr.bf16.mxu0 %v4917_v10  ;;  %v4650_v45 = vpack.c.bf16 %v3137_v41, %v3136_v40  ;;  %v3166_v40 = vld [vmem:[%s6374_s9 + $0x6a0] sm:$0xff]  ;;  %v3167_v41 = vld [vmem:[%s6374_s9 + $0x6a8] sm:$0xff] }
 0x5f2   : > { %4621 = vmatpush3.bf16.msra.mxu1 %v4620_v43  ;;  %v3042_v43 = vld [vmem:[%s6374_s9 + $0x2c0] sm:$0xff] }
 0x5f3   : > { %4622 = vmatprep.subr.bf16.mxu1 %v4917_v10  ;;  %v4509_v48 = vpack.c.bf16 %v3043_v44, %v3042_v43  ;;  %v3168_v43 = vld [vmem:[%s6374_s9 + $0x6b0] sm:$0xff]  ;;  %v3169_v44 = vld [vmem:[%s6374_s9 + $0x6b8] sm:$0xff] }
 0x5f4   : > { %4480 = vmatpush3.bf16.msra.mxu0 %v4479_v46  ;;  %v3138_v46 = vld [vmem:[%s6374_s9 + $0x5c0] sm:$0xff] }
 0x5f5   : > { %4481 = vmatprep.subr.bf16.mxu0 %v4917_v10  ;;  %v4653_v51 = vpack.c.bf16 %v3139_v47, %v3138_v46  ;;  %v3170_v46 = vld [vmem:[%s6374_s9 + $0x6c0] sm:$0xff]  ;;  %v3171_v47 = vld [vmem:[%s6374_s9 + $0x6c8] sm:$0xff] }
 0x5f6   : > { %4624 = vmatpush3.bf16.msra.mxu1 %v4623_v49  ;;  %v3044_v49 = vld [vmem:[%s6374_s9 + $0x2d0] sm:$0xff] }
 0x5f7   : > { %4625 = vmatprep.subr.bf16.mxu1 %v4917_v10  ;;  %v4512_v54 = vpack.c.bf16 %v3045_v50, %v3044_v49  ;;  %v3172_v49 = vld [vmem:[%s6374_s9 + $0x6d0] sm:$0xff]  ;;  %v3173_v50 = vld [vmem:[%s6374_s9 + $0x6d8] sm:$0xff] }
 0x5f8   : > { %4483 = vmatpush3.bf16.msra.mxu0 %v4482_v52  ;;  %v3140_v52 = vld [vmem:[%s6374_s9 + $0x5d0] sm:$0xff] }
 0x5f9   : > { %4484 = vmatprep.subr.bf16.mxu0 %v4917_v10  ;;  %v4656_v57 = vpack.c.bf16 %v3141_v53, %v3140_v52  ;;  %v3174_v52 = vld [vmem:[%s6374_s9 + $0x6e0] sm:$0xff]  ;;  %v3175_v53 = vld [vmem:[%s6374_s9 + $0x6e8] sm:$0xff] }
 0x5fa   : > { %4627 = vmatpush3.bf16.msra.mxu1 %v4626_v55  ;;  %v3046_v55 = vld [vmem:[%s6374_s9 + $0x2e0] sm:$0xff] }
 0x5fb   : > { %4628 = vmatprep.subr.bf16.mxu1 %v4917_v10  ;;  %v4515_v60 = vpack.c.bf16 %v3047_v56, %v3046_v55  ;;  %v3176_v55 = vld [vmem:[%s6374_s9 + $0x6f0] sm:$0xff]  ;;  %v3177_v56 = vld [vmem:[%s6374_s9 + $0x6f8] sm:$0xff] }
 0x5fc   : > { %4486 = vmatpush3.bf16.msra.mxu0 %v4485_v58  ;;  %v3142_v58 = vld [vmem:[%s6374_s9 + $0x5e0] sm:$0xff] }
 0x5fd   : > { %4487 = vmatprep.subr.bf16.mxu0 %v4917_v10  ;;  %v4659_v63 = vpack.c.bf16 %v3143_v59, %v3142_v58  ;;  %v3178_v58 = vld [vmem:[%s6374_s9 + $0x700] sm:$0xff]  ;;  %v3179_v59 = vld [vmem:[%s6374_s9 + $0x708] sm:$0xff] }
 0x5fe   : > { %4630 = vmatpush3.bf16.msra.mxu1 %v4629_v61  ;;  %v3048_v61 = vld [vmem:[%s6374_s9 + $0x2f0] sm:$0xff] }
 0x5ff   : > { %4631 = vmatprep.subr.bf16.mxu1 %v4917_v10  ;;  %v4518_v3 = vpack.c.bf16 %v3049_v62, %v3048_v61  ;;  %v2622_v61 = vrot.slane %v5497_v1, 5  ;;  %v3180_v62 = vld [vmem:[%s6374_s9 + $0x710] sm:$0xff] }
 0x600   : > { %4489 = vmatpush3.bf16.msra.mxu0 %v4488_v0  ;;  %v3144_v0 = vld [vmem:[%s6374_s9 + $0x5f0] sm:$0xff] }
 0x601   : > { %4490 = vmatprep.subr.bf16.mxu0 %v4917_v10 }
 0x602   : > { %4633 = vmatpush3.bf16.msra.mxu1 %v4632_v6  ;;  %v4662_v6 = vpack.c.bf16 %v3145_v2, %v3144_v0  ;;  %v3182_v2 = vld [vmem:[%s6374_s9 + $0x720] sm:$0xff] }
 0x603   : > { %4634 = vmatprep.subr.bf16.mxu1 %v4917_v10 }
 0x604   : > { %4492 = vmatpush3.bf16.msra.mxu0 %v4491_v9  ;;  %v1903_v9 = vrot.slane %v5505_v4, 5  ;;  %v3150_v4 = vld [vmem:[%s6374_s9 + $0x620] sm:$0xff] }
 0x605   : > { %4493 = vmatprep.subr.bf16.mxu0 %v4917_v10 }
 0x606   : > { %4636 = vmatpush3.bf16.msra.mxu1 %v4635_v13  ;;  %v3148_v13 = vld [vmem:[%s6374_s9 + $0x610] sm:$0xff] }
 0x607   : > { %4637 = vmatprep.subr.bf16.mxu1 %v4917_v10  ;;  %v4668_v15 = vpack.c.bf16 %v3149_v14, %v3148_v13  ;;  %v3188_v14 = vld [vmem:[%s6374_s9 + $0x750] sm:$0xff] }
 0x608   : > { %4495 = vmatpush3.bf16.msra.mxu0 %v4494_v16  ;;  %v3151_v16 = vld [vmem:[%s6374_s9 + $0x628] sm:$0xff] }
 0x609   : > { %4496 = vmatprep.subr.bf16.mxu0 %v4917_v10  ;;  %v4671_v17 = vpack.c.bf16 %v3151_v16, %v3150_v4  ;;  %v3190_v16 = vld [vmem:[%s6374_s9 + $0x760] sm:$0xff] }
 0x60a   : > { %4639 = vmatpush3.bf16.msra.mxu1 %v4638_v19  ;;  %v3153_v19 = vld [vmem:[%s6374_s9 + $0x638] sm:$0xff] }
 0x60b   : > { %3870 = vmatmul.mubr.f32.vlgmr.msra.gmra.mrb[12].mxu0 %v1813_v23  ;;  %4640 = vmatprep.subr.bf16.mxu1 %v4917_v10  ;;  %v4674_v20 = vpack.c.bf16 %v3153_v19, %v3152_v18  ;;  %v3192_v19 = vld [vmem:[%s6374_s9 + $0x770] sm:$0xff] }
 0x60c   : > { %4498 = vmatpush3.bf16.msra.mxu0 %v4497_v22  ;;  %3904 = vmatprep.mubr.msk.f32.mxu0 %vm4916_vm0, %v4915_v5  ;;  %v3155_v22 = vld [vmem:[%s6374_s9 + $0x648] sm:$0xff] }
 0x60d   : > { %4080 = vmatmul.mubr.f32.vlgmr.msra.gmra.mrb[8].mxu1 %v2352_v27  ;;  %4499 = vmatprep.subr.bf16.mxu0 %v4917_v10  ;;  %v4677_v23 = vpack.c.bf16 %v3155_v22, %v3154_v21  ;;  %v3158_v27 = vld [vmem:[%s6374_s9 + $0x660] sm:$0xff] }
 0x60e   : > { %4642 = vmatpush3.bf16.msra.mxu1 %v4641_v26  ;;  %4114 = vmatprep.mubr.msk.f32.mxu1 %vm4916_vm0, %v4915_v5  ;;  %v4680_v26 = vpack.c.bf16 %v3157_v25, %v3156_v24  ;;  %v4683_v29 = vpack.c.bf16 %v3159_v28, %v3158_v27  ;;  %v3194_v22 = vld [vmem:[%s6374_s9 + $0x780] sm:$0xff]  ;;  %v2712_v25 = vrot.slane %v5497_v1, 6  ;;  %v3197_v27 = vld [vmem:[%s6374_s9 + $0x798] sm:$0xff] }
 0x60f   : > { %4643 = vmatprep.subr.bf16.mxu1 %v4917_v10 }
 0x610   : > { %4501 = vmatpush3.bf16.msra.mxu0 %v4500_v30  ;;  %v3160_v30 = vld [vmem:[%s6374_s9 + $0x670] sm:$0xff] }
 0x611   : > { %4502 = vmatprep.subr.bf16.mxu0 %v4917_v10  ;;  %v4686_v32 = vpack.c.bf16 %v3161_v31, %v3160_v30  ;;  %v3199_v30 = vld [vmem:[%s6374_s9 + $0x7a8] sm:$0xff] }
 0x612   : > { %4645 = vmatpush3.bf16.msra.mxu1 %v4644_v33  ;;  %v3162_v33 = vld [vmem:[%s6374_s9 + $0x680] sm:$0xff] }
 0x613   : > { %4646 = vmatprep.subr.bf16.mxu1 %v4917_v10  ;;  %v4689_v35 = vpack.c.bf16 %v3163_v34, %v3162_v33  ;;  %v3202_v34 = vld [vmem:[%s6374_s9 + $0x7c0] sm:$0xff] }
 0x614   : > { %4504 = vmatpush3.bf16.msra.mxu0 %v4503_v36  ;;  %v2532_v36 = vrot.slane %v5497_v1, 4 }
 0x615   : > { %4505 = vmatprep.subr.bf16.mxu0 %v4917_v10 }
 0x616   : > { %4648 = vmatpush3.bf16.msra.mxu1 %v4647_v39  ;;  %v4692_v39 = vpack.c.bf16 %v3165_v38, %v3164_v37  ;;  %v3204_v37 = vld [vmem:[%s6374_s9 + $0x7d0] sm:$0xff]  ;;  %v3205_v38 = vld [vmem:[%s6374_s9 + $0x7d8] sm:$0xff] }
 0x617   : > { %4649 = vmatprep.subr.bf16.mxu1 %v4917_v10 }
 0x618   : > { %4507 = vmatpush3.bf16.msra.mxu0 %v4506_v42  ;;  %v4695_v42 = vpack.c.bf16 %v3167_v41, %v3166_v40  ;;  %v3206_v40 = vld [vmem:[%s6374_s9 + $0x7e0] sm:$0xff]  ;;  %v3207_v41 = vld [vmem:[%s6374_s9 + $0x7e8] sm:$0xff] }
 0x619   : > { %4508 = vmatprep.subr.bf16.mxu0 %v4917_v10 }
 0x61a   : > { %4651 = vmatpush3.bf16.msra.mxu1 %v4650_v45  ;;  %v4698_v45 = vpack.c.bf16 %v3169_v44, %v3168_v43  ;;  %v3208_v43 = vld [vmem:[%s6374_s9 + $0x7f0] sm:$0xff]  ;;  %v3209_v44 = vld [vmem:[%s6374_s9 + $0x7f8] sm:$0xff] }
 0x61b   : > { %4652 = vmatprep.subr.bf16.mxu1 %v4917_v10 }
 0x61c   : > { %4510 = vmatpush3.bf16.msra.mxu0 %v4509_v48  ;;  %v4701_v48 = vpack.c.bf16 %v3171_v47, %v3170_v46  ;;  %v2802_v46 = vrot.slane %v5497_v1, 7 }
 0x61d   : > { %4511 = vmatprep.subr.bf16.mxu0 %v4917_v10 }
 0x61e   : > { %4654 = vmatpush3.bf16.msra.mxu1 %v4653_v51  ;;  %v4704_v51 = vpack.c.bf16 %v3173_v50, %v3172_v49  ;;  %v1437_v49 = vld [vmem:[%s6375_s10] sm:$0x1] }
 0x61f   : > { %4655 = vmatprep.subr.bf16.mxu1 %v4917_v10 }
 0x620   : > { %4513 = vmatpush3.bf16.msra.mxu0 %v4512_v54  ;;  %v4707_v54 = vpack.c.bf16 %v3175_v53, %v3174_v52 }
 0x621   : > { %4514 = vmatprep.subr.bf16.mxu0 %v4917_v10 }
 0x622   : > { %4657 = vmatpush3.bf16.msra.mxu1 %v4656_v57  ;;  %v4710_v57 = vpack.c.bf16 %v3177_v56, %v3176_v55 }
 0x623   : > { %4658 = vmatprep.subr.bf16.mxu1 %v4917_v10 }
 0x624   : > { %4516 = vmatpush3.bf16.msra.mxu0 %v4515_v60  ;;  %v4713_v60 = vpack.c.bf16 %v3179_v59, %v3178_v58 }
 0x625   : > { %4517 = vmatprep.subr.bf16.mxu0 %v4917_v10 }
 0x626   : > { %4660 = vmatpush3.bf16.msra.mxu1 %v4659_v63  ;;  %v3181_v63 = vld [vmem:[%s6374_s9 + $0x718] sm:$0xff] }
 0x627   : > { %4661 = vmatprep.subr.bf16.mxu1 %v4917_v10  ;;  %v4716_v0 = vpack.c.bf16 %v3181_v63, %v3180_v62 }
 0x628   : > { %4519 = vmatpush3.bf16.msra.mxu0 %v4518_v3  ;;  %v3183_v3 = vld [vmem:[%s6374_s9 + $0x728] sm:$0xff] }
 0x62a   : > { %4663 = vmatpush3.bf16.msra.mxu1 %v4662_v6  ;;  %v4719_v6 = vpack.c.bf16 %v3183_v3, %v3182_v2 }
 0x62b   : > { %3905 = vmatmul.mubr.f32.vlgmr.msra.gmra.mrb[12].mxu0 %v1903_v9  ;;  %4664 = vmatprep.subr.bf16.mxu1 %v4917_v10  ;;  %v4722_v9 = vpack.c.bf16 %v3185_v8, %v3184_v7 }
 0x62d   : > { %4115 = vmatmul.mubr.f32.vlgmr.msra.gmra.mrb[8].mxu1 %v2442_v12  ;;  %v3187_v12 = vld [vmem:[%s6374_s9 + $0x748] sm:$0xff] }
 0x62e   : > { %4666 = vmatpush3.bf16.msra.mxu1 %v4665_v11  ;;  %4149 = vmatprep.mubr.msk.f32.mxu1 %vm4916_vm0, %v4915_v5  ;;  %v3186_v11 = vld [vmem:[%s6374_s9 + $0x740] sm:$0xff] }
 0x62f   : > { %4667 = vmatprep.subr.bf16.mxu1 %v4917_v10  ;;  %v4725_v13 = vpack.c.bf16 %v3187_v12, %v3186_v11 }
 0x632   : > { %4669 = vmatpush3.bf16.msra.mxu1 %v4668_v15  ;;  %v3189_v15 = vld [vmem:[%s6374_s9 + $0x758] sm:$0xff] }
 0x633   : > { %4670 = vmatprep.subr.bf16.mxu1 %v4917_v10  ;;  %v4728_v4 = vpack.c.bf16 %v3189_v15, %v3188_v14 }
 0x636   : > { %4672 = vmatpush3.bf16.msra.mxu1 %v4671_v17  ;;  %v3191_v17 = vld [vmem:[%s6374_s9 + $0x768] sm:$0xff] }
 0x637   : > { %4673 = vmatprep.subr.bf16.mxu1 %v4917_v10  ;;  %v4731_v18 = vpack.c.bf16 %v3191_v17, %v3190_v16 }
 0x63a   : > { %4675 = vmatpush3.bf16.msra.mxu1 %v4674_v20  ;;  %v3193_v20 = vld [vmem:[%s6374_s9 + $0x778] sm:$0xff] }
 0x63b   : > { %4676 = vmatprep.subr.bf16.mxu1 %v4917_v10  ;;  %v4734_v21 = vpack.c.bf16 %v3193_v20, %v3192_v19 }
 0x63e   : > { %4678 = vmatpush3.bf16.msra.mxu1 %v4677_v23  ;;  %v3195_v23 = vld [vmem:[%s6374_s9 + $0x788] sm:$0xff] }
 0x63f   : > { %4679 = vmatprep.subr.bf16.mxu1 %v4917_v10  ;;  %v4737_v24 = vpack.c.bf16 %v3195_v23, %v3194_v22 }
 0x642   : > { %4681 = vmatpush3.bf16.msra.mxu1 %v4680_v26  ;;  %v3196_v26 = vld [vmem:[%s6374_s9 + $0x790] sm:$0xff] }
 0x643   : > { %4682 = vmatprep.subr.bf16.mxu1 %v4917_v10  ;;  %v4740_v28 = vpack.c.bf16 %v3197_v27, %v3196_v26 }
 0x646   : > { %4684 = vmatpush3.bf16.msra.mxu1 %v4683_v29  ;;  %v3198_v29 = vld [vmem:[%s6374_s9 + $0x7a0] sm:$0xff] }
 0x647   : > { %4685 = vmatprep.subr.bf16.mxu1 %v4917_v10  ;;  %v4743_v31 = vpack.c.bf16 %v3199_v30, %v3198_v29 }
 0x64a   : > { %4687 = vmatpush3.bf16.msra.mxu1 %v4686_v32  ;;  %v3200_v32 = vld [vmem:[%s6374_s9 + $0x7b0] sm:$0xff] }
 0x64b   : > { %4688 = vmatprep.subr.bf16.mxu1 %v4917_v10 }
 0x64d   : > { %4150 = vmatmul.mubr.f32.vlgmr.msra.gmra.mrb[8].mxu1 %v2532_v36 }
 0x64e   : > { %4690 = vmatpush3.bf16.msra.mxu1 %v4689_v35  ;;  %4184 = vmatprep.mubr.msk.f32.mxu1 %vm4916_vm0, %v4915_v5  ;;  %v3203_v35 = vld [vmem:[%s6374_s9 + $0x7c8] sm:$0xff] }
 0x64f   : > { %4691 = vmatprep.subr.bf16.mxu1 %v4917_v10  ;;  %v4749_v36 = vpack.c.bf16 %v3203_v35, %v3202_v34 }
 0x652   : > { %4693 = vmatpush3.bf16.msra.mxu1 %v4692_v39  ;;  %v4752_v39 = vpack.c.bf16 %v3205_v38, %v3204_v37 }
 0x653   : > { %4694 = vmatprep.subr.bf16.mxu1 %v4917_v10 }
 0x656   : > { %4696 = vmatpush3.bf16.msra.mxu1 %v4695_v42  ;;  %v4755_v42 = vpack.c.bf16 %v3207_v41, %v3206_v40 }
 0x657   : > { %4697 = vmatprep.subr.bf16.mxu1 %v4917_v10 }
 0x65a   : > { %4699 = vmatpush3.bf16.msra.mxu1 %v4698_v45  ;;  %v4758_v45 = vpack.c.bf16 %v3209_v44, %v3208_v43 }
 0x65b   : > { %4700 = vmatprep.subr.bf16.mxu1 %v4917_v10 }
 0x65e   : > { %4702 = vmatpush3.bf16.msra.mxu1 %v4701_v48 }
 0x65f   : > { %4703 = vmatprep.subr.bf16.mxu1 %v4917_v10 }
 0x662   : > { %4705 = vmatpush3.bf16.msra.mxu1 %v4704_v51 }
 0x663   : > { %4706 = vmatprep.subr.bf16.mxu1 %v4917_v10 }
 0x666   : > { %4708 = vmatpush3.bf16.msra.mxu1 %v4707_v54 }
 0x667   : > { %4709 = vmatprep.subr.bf16.mxu1 %v4917_v10 }
 0x66a   : > { %4711 = vmatpush3.bf16.msra.mxu1 %v4710_v57 }
 0x66b   : > { %4712 = vmatprep.subr.bf16.mxu1 %v4917_v10 }
 0x66d   : > { %4185 = vmatmul.mubr.f32.vlgmr.msra.gmra.mrb[8].mxu1 %v2622_v61 }
 0x66e   : > { %4714 = vmatpush3.bf16.msra.mxu1 %v4713_v60  ;;  %4219 = vmatprep.mubr.msk.f32.mxu1 %vm4916_vm0, %v4915_v5 }
 0x66f   : > { %4715 = vmatprep.subr.bf16.mxu1 %v4917_v10 }
 0x672   : > { %4717 = vmatpush3.bf16.msra.mxu1 %v4716_v0 }
 0x673   : > { %4718 = vmatprep.subr.bf16.mxu1 %v4917_v10 }
 0x676   : > { %4720 = vmatpush3.bf16.msra.mxu1 %v4719_v6 }
 0x677   : > { %4721 = vmatprep.subr.bf16.mxu1 %v4917_v10 }
 0x67a   : > { %4723 = vmatpush3.bf16.msra.mxu1 %v4722_v9 }
 0x67b   : > { %4724 = vmatprep.subr.bf16.mxu1 %v4917_v10 }
 0x67e   : > { %4726 = vmatpush3.bf16.msra.mxu1 %v4725_v13 }
 0x67f   : > { %4727 = vmatprep.subr.bf16.mxu1 %v4917_v10 }
 0x682   : > { %4729 = vmatpush3.bf16.msra.mxu1 %v4728_v4 }
 0x683   : > { %4730 = vmatprep.subr.bf16.mxu1 %v4917_v10 }
 0x686   : > { %4732 = vmatpush3.bf16.msra.mxu1 %v4731_v18 }
 0x687   : > { %4733 = vmatprep.subr.bf16.mxu1 %v4917_v10 }
 0x68a   : > { %4735 = vmatpush3.bf16.msra.mxu1 %v4734_v21 }
 0x68b   : > { %4736 = vmatprep.subr.bf16.mxu1 %v4917_v10 }
 0x68d   : > { %4220 = vmatmul.mubr.f32.vlgmr.msra.gmra.mrb[8].mxu1 %v2712_v25 }
 0x68e   : > { %4738 = vmatpush3.bf16.msra.mxu1 %v4737_v24  ;;  %4254 = vmatprep.mubr.msk.f32.mxu1 %vm4916_vm0, %v4915_v5  ;;  %v3201_v5 = vld [vmem:[%s6374_s9 + $0x7b8] sm:$0xff] }
 0x68f   : > { %4739 = vmatprep.subr.bf16.mxu1 %v4917_v10  ;;  %v4746_v33 = vpack.c.bf16 %v3201_v5, %v3200_v32 }
 0x692   : > { %4741 = vmatpush3.bf16.msra.mxu1 %v4740_v28 }
 0x693   : > { %4742 = vmatprep.subr.bf16.mxu1 %v4917_v10 }
 0x696   : > { %4744 = vmatpush3.bf16.msra.mxu1 %v4743_v31 }
 0x697   : > { %4745 = vmatprep.subr.bf16.mxu1 %v4917_v10 }
 0x69a   : > { %4747 = vmatpush3.bf16.msra.mxu1 %v4746_v33 }
 0x69b   : > { %4748 = vmatprep.subr.bf16.mxu1 %v4917_v10 }
 0x69e   : > { %4750 = vmatpush3.bf16.msra.mxu1 %v4749_v36 }
 0x69f   : > { %4751 = vmatprep.subr.bf16.mxu1 %v4917_v10 }
 0x6a2   : > { %4753 = vmatpush3.bf16.msra.mxu1 %v4752_v39 }
 0x6a3   : > { %4754 = vmatprep.subr.bf16.mxu1 %v4917_v10 }
 0x6a6   : > { %4756 = vmatpush3.bf16.msra.mxu1 %v4755_v42 }
 0x6a7   : > { %4757 = vmatprep.subr.bf16.mxu1 %v4917_v10 }
 0x6aa   : > { %4759 = vmatpush3.bf16.msra.mxu1 %v4758_v45 }
 0x6ad   : > { %4255 = vmatmul.mubr.f32.vlgmr.msra.gmra.mrb[8].mxu1 %v2802_v46 }
 0x6fe   : > { %v1971_v47 = vpop.f32.mrb[12].mxu0 }
 0x6ff   : > { %v3906_v48 = vpop.f32.mrb[13].mxu0  ;;  %v4760_v50 = vadd.f32 %v1971_v47, %v1437_v49 }
 0x780   : > { %v2870_v51 = vpop.f32.mrb[8].mxu1 }
 0x781   : > { %v4761_v52 = vadd.f32 %v4760_v50, %v2870_v51  ;;  %v4256_v10 = vpop.f32.mrb[9].mxu1 }
 0x783   : > { %2876 = vst.msk [vmem:[%s376_s22] sm:$0x1] %vm2875_vm5, %v4761_v52 }
 0x784   : > { %4864 = shalt.err (!%p4861_p3)
}
 0x785   : > { %s4865_s13 = scalar_lea.hbm %s6323_s30, 16  ;;  %s4869_s25 = scalar_lea.hbm %s6376_s11, 32 }
 0x786   : > { %p4866_p4 = scmp.ne.s32.totalorder %s6323_s30, %s4865_s13  ;;  %p4870_p9 = scmp.lt.u32.totalorder %s6323_s30, %s6376_s11 }
 0x787   : > { %p4871_p10 = scmp.lt.u32.totalorder %s4869_s25, %s4865_s13  ;;  %p4873_p12 = scmp.lt.u32.totalorder %s4865_s13, %s6323_s30 }
 0x788   : > { %p4867_p7 = pnand %p4866_p4, %p5018_p5 }
 0x789   : > { %p4872_p11 = por %p4871_p10, %p4870_p9 }
 0x78a   : > { %p4868_p8 = pneg %p4867_p7 }
 0x78b   : > { %p4874_p13 = por %p4873_p12, %p4872_p11 }
 0x78d   : > { %p4875_p0 = pnand %p4874_p13, %p4868_p8 }
 0x78f   : > { %4878 = shalt.err (!%p4875_p0)
}
 0x790   : > { %4794 = dma.vmem_to_hbm [thread:$0]  (%p5018_p5), %s6325_s24, 16, %s6323_s30, %s2878_s12  }
 0x791 PF: > { %p4800_p1 = scmp.ge.s32.totalorder %s4913_s20, 2  ;;  %s2902_s0 = sand.u32 1, %s4901_s17  }
 0x792   : > { %s2903_s21 = scalar_lea.sflag [#allocation3], %s2902_s0 }
 0x793   : > { %p4797_p2 = pnand %p4800_p1, %p5022_p6 }
 0x795   : > { %4896 = dma.done.wait (!%p4797_p2), %s2903_s21, 16  }
 0x796   : > { %4898 = vsyncadd (!%p4797_p2), %s2903_s21, 4294967280  ;;  %p21_p3 = scmp.ge.s32.totalorder %s5005_s23, 4   ;;  %s6381_s17 = smov %s4905_s18 }
 0x797   : > { %s6382_s18 = smov %s4909_s19  ;;  %s6383_s19 = smov %s5016_s26 }
 0x798   : > { %s6384_s20 = smov %s5005_s23  ;;  %23 = sbr.rel (!%p21_p3) target bundleno = 5 (0x5), region = 118 }
 0x79f   :  { %2907 = vsyncpa [#allocation3], 1 }
 0x7a0   :  { %2909 = vsyncpa [#allocation3 + $0x1], 1 }

</bundles_post_ra>
